<compile_context>
chip_gen: v6e
topology: v6e:2x2x1
jax: 0.10.0
libtpu: 0.0.40
codegen_flags: <defaults>
</compile_context>

<pallas_src>
import functools
import math

import jax
import jax.numpy as jnp
from jax import lax
from jax.experimental import pallas as pl
from jax.experimental.pallas import tpu as pltpu


# ----------------------------------------------------------------------------
# Generation-aware configuration (v5e / v6e / v7x)
# ----------------------------------------------------------------------------

def _tpu_config():
    try:
        kind = jax.devices()[0].device_kind.lower()
    except Exception:
        kind = ""
    is_v7 = "v7" in kind
    is_v6 = "v6" in kind
    try:
        vmem_cap = int(pltpu.get_tpu_info().vmem_capacity_bytes)
    except Exception:
        vmem_cap = (64 if is_v7 else 128) * 1024 * 1024
    vmem_limit = max(32 * 1024 * 1024, min(int(0.6 * vmem_cap), 96 * 1024 * 1024))
    # v7x: half the VMEM of v5e/v6e -> halve the pixel tile (512 already sits
    # near the HBM roofline).  v6e: double VMEM, half BW -> deepen K/V buffers.
    pixel_tile = 512 if is_v7 else 1024
    kv_buffers = 3 if is_v6 else None
    return {"vmem_limit": vmem_limit, "pixel_tile": pixel_tile,
            "kv_buffers": kv_buffers}


_CFG = _tpu_config()


def _cparams(semantics):
    return pltpu.CompilerParams(dimension_semantics=semantics,
                                vmem_limit_bytes=_CFG["vmem_limit"])


def _kv_spec(shape, index_map):
    """BlockSpec for the two dominant sampled-K/V input streams.
    On v6e (plentiful VMEM, lower HBM BW) request 3-deep pipelining."""
    depth = _CFG["kv_buffers"]
    if depth is not None:
        try:
            return pl.BlockSpec(shape, index_map, pipeline_mode=pl.Buffered(depth))
        except Exception:
            pass
    return pl.BlockSpec(shape, index_map)


def _pick_tile(total, max_tile):
    """Return (pixel_tile, padded_total).  The tile is either the full extent
    or a multiple of 128; the pixel axis is padded up to a tile multiple so a
    block never silently grows to the whole image (VMEM-safe on v7x)."""
    if total <= max_tile:
        return total, total
    best_t, best_pad = 128, None
    t = (max_tile // 128) * 128
    while t >= 128:
        pad = (-total) % t
        if best_pad is None or pad < best_pad:
            best_t, best_pad = t, pad
        if pad == 0:
            break
        t -= 128
    return best_t, total + best_pad


# ----------------------------------------------------------------------------
# Kernel 1: fused QKV 1x1 projections + shared positional-encoding add
# ----------------------------------------------------------------------------

def _qkv_proj_kernel(q_ref, k_ref, v_ref, pos_ref, wq_ref, wk_ref, wv_ref,
                     qo_ref, ko_ref, vo_ref):
    pos = pos_ref[...]                                       # (C, tp) f32, shared
    qa = (q_ref[0] + pos).astype(jnp.bfloat16)               # bf16 MXU operands
    ka = (k_ref[0] + pos).astype(jnp.bfloat16)
    va = v_ref[0].astype(jnp.bfloat16)
    qo_ref[0] = jnp.dot(wq_ref[...], qa,
                        preferred_element_type=jnp.float32).astype(qo_ref.dtype)
    ko_ref[0] = jnp.dot(wk_ref[...], ka,
                        preferred_element_type=jnp.float32).astype(ko_ref.dtype)
    vo_ref[0] = jnp.dot(wv_ref[...], va,
                        preferred_element_type=jnp.float32).astype(vo_ref.dtype)


def qkv_proj_pallas(q_cm, k_cm, v_cm, pos, wq, wk, wv, *, tp):
    """q/k/v: (n, C, HWp) f32; pos: (C, HWp) f32; w*: (C, C).
    Returns q_proj (f32) and k_proj / v_proj (bf16, gather sources)."""
    n, C, HWp = q_cm.shape
    grid = (n, HWp // tp)
    act_spec = pl.BlockSpec((1, C, tp), lambda i, j: (i, 0, j))
    pos_spec = pl.BlockSpec((C, tp), lambda i, j: (0, j))
    w_spec = pl.BlockSpec((C, C), lambda i, j: (0, 0))
    return pl.pallas_call(
        _qkv_proj_kernel,
        out_shape=(jax.ShapeDtypeStruct((n, C, HWp), jnp.float32),
                   jax.ShapeDtypeStruct((n, C, HWp), jnp.bfloat16),
                   jax.ShapeDtypeStruct((n, C, HWp), jnp.bfloat16)),
        grid=grid,
        in_specs=[act_spec, act_spec, act_spec, pos_spec,
                  w_spec, w_spec, w_spec],
        out_specs=(act_spec, act_spec, act_spec),
        compiler_params=_cparams(("parallel", "parallel")),
    )(q_cm, k_cm, v_cm, pos,
      wq.astype(jnp.bfloat16), wk.astype(jnp.bfloat16), wv.astype(jnp.bfloat16))


# ----------------------------------------------------------------------------
# Kernel 2 (fused): per-pixel k^2 softmax attention + fc + MLP + residual
#                   + GroupNorm(1, C) per-tile partial statistics
# ----------------------------------------------------------------------------

def _attn_mlp_stats_kernel(q_ref, k_ref, v_ref, wfc_ref, w1_ref, b1_ref,
                           w2_ref, b2_ref, out_ref, ssum_ref, ssq_ref, *,
                           n_head, d_k, d_v, hw_real, tp, needs_mask):
    scale = 1.0 / math.sqrt(float(d_k))
    q = q_ref[0]                                             # (C, tp) f32

    # ---- softmax attention over the k^2 flow-guided samples (head-looped) ---
    # Head loop keeps the live working set at (d, K2, tp) instead of
    # (C, K2, tp): no multi-MiB materialized intermediate, far less spill.
    head_out = []
    for h in range(n_head):
        qh = q[h * d_k:(h + 1) * d_k] * scale                          # (d_k, tp)
        kh = k_ref[0, h * d_k:(h + 1) * d_k].astype(jnp.float32)       # (d_k, K2, tp)
        s = jnp.sum(qh[:, None, :] * kh, axis=0)                       # (K2, tp)
        m = jnp.max(s, axis=0, keepdims=True)
        p = jnp.exp(s - m)
        denom = jnp.sum(p, axis=0, keepdims=True)
        # EUP reciprocal keeps the divide off the VALU path (~1e-3 rel. error).
        attn = p * pl.reciprocal(denom, approx=True)                   # (K2, tp)
        vh = v_ref[0, h * d_v:(h + 1) * d_v].astype(jnp.float32)       # (d_v, K2, tp)
        head_out.append(jnp.sum(attn[None, :, :] * vh, axis=1))        # (d_v, tp)
    attn_out = jnp.concatenate(head_out, axis=0)                       # (C, tp) f32

    # ---- fc (1x1, no bias) + MLP + residual (bf16 MXU, f32 accumulation) ----
    y = jnp.dot(wfc_ref[...], attn_out.astype(jnp.bfloat16),
                preferred_element_type=jnp.float32)                    # (C, tp)
    hmid = jnp.dot(w1_ref[...], y.astype(jnp.bfloat16),
                   preferred_element_type=jnp.float32) + b1_ref[...]
    hmid = jnp.where(hmid >= 0, hmid, 0.2 * hmid)                      # LeakyReLU(0.2)
    z = jnp.dot(w2_ref[...], hmid.astype(jnp.bfloat16),
                preferred_element_type=jnp.float32) + b2_ref[...]
    o = y + z                                                          # residual
    out_ref[0] = o.astype(out_ref.dtype)                               # bf16 intermediate

    # ---- GroupNorm(1, C) per-tile partial statistics (f32, pre-cast) -------
    # TODO(synk): single-pass E[x^2]-mean^2 can lose precision vs torch's
    # GroupNorm for very large activation magnitudes.
    if needs_mask:
        col = (lax.broadcasted_iota(jnp.int32, (1, tp), 1)
               + pl.program_id(1) * tp)
        valid = (col < hw_real).astype(jnp.float32)                    # (1, tp)
        om = o * valid
        ssum_ref[0, 0] = jnp.sum(om, axis=-1, keepdims=True)           # (C, 1)
        ssq_ref[0, 0] = jnp.sum(om * o, axis=-1, keepdims=True)
    else:
        ssum_ref[0, 0] = jnp.sum(o, axis=-1, keepdims=True)
        ssq_ref[0, 0] = jnp.sum(o * o, axis=-1, keepdims=True)


def attn_mlp_stats_pallas(q_proj, samp_k, samp_v, params, *, n_head, d_k, d_v,
                          tp, hw_real):
    """q_proj: (n, C, HWp) f32; samp_k/v: (n, C, K2, HWp) bf16.
    Returns (out_unnormalized bf16 (n,C,HWp), ssum, ssq per tile)."""
    n, C, HWp = q_proj.shape
    K2 = samp_k.shape[2]
    T = HWp // tp
    hidden = params["mlp_w1"].shape[0]
    grid = (n, T)

    kern = functools.partial(_attn_mlp_stats_kernel, n_head=n_head, d_k=d_k,
                             d_v=d_v, hw_real=hw_real, tp=tp,
                             needs_mask=(HWp != hw_real))
    stat_spec = pl.BlockSpec((1, 1, C, 1), lambda i, j: (i, j, 0, 0))

    return pl.pallas_call(
        kern,
        out_shape=(jax.ShapeDtypeStruct((n, C, HWp), jnp.bfloat16),
                   jax.ShapeDtypeStruct((n, T, C, 1), jnp.float32),
                   jax.ShapeDtypeStruct((n, T, C, 1), jnp.float32)),
        grid=grid,
        in_specs=[
            pl.BlockSpec((1, C, tp), lambda i, j: (i, 0, j)),
            _kv_spec((1, C, K2, tp), lambda i, j: (i, 0, 0, j)),
            _kv_spec((1, C, K2, tp), lambda i, j: (i, 0, 0, j)),
            pl.BlockSpec((C, C), lambda i, j: (0, 0)),
            pl.BlockSpec((hidden, C), lambda i, j: (0, 0)),
            pl.BlockSpec((hidden, 1), lambda i, j: (0, 0)),
            pl.BlockSpec((C, hidden), lambda i, j: (0, 0)),
            pl.BlockSpec((C, 1), lambda i, j: (0, 0)),
        ],
        out_specs=(pl.BlockSpec((1, C, tp), lambda i, j: (i, 0, j)),
                   stat_spec, stat_spec),
        compiler_params=_cparams(("parallel", "parallel")),
    )(q_proj, samp_k, samp_v,
      params["fc"].astype(jnp.bfloat16),
      params["mlp_w1"].astype(jnp.bfloat16),
      params["mlp_b1"].reshape(hidden, 1).astype(jnp.float32),
      params["mlp_w2"].astype(jnp.bfloat16),
      params["mlp_b2"].reshape(C, 1).astype(jnp.float32))


# ----------------------------------------------------------------------------
# Kernel 3: GroupNorm(1, C) apply (reduces the tiny per-tile partial stats)
# ----------------------------------------------------------------------------

def _gn_apply_kernel(x_ref, ssum_ref, ssq_ref, g_ref, b_ref, o_ref, *, count, eps):
    x = x_ref[0].astype(jnp.float32)                 # (C, tp)
    mean = jnp.sum(ssum_ref[...]) / count
    ex2 = jnp.sum(ssq_ref[...]) / count
    var = ex2 - mean * mean                          # biased variance (torch GN)
    inv = lax.rsqrt(var + eps)
    o_ref[0] = ((x - mean) * inv) * g_ref[...] + b_ref[...]


def gn_apply_pallas(out_bf16, ssum, ssq, gamma, beta, *, tp, count, eps=1e-5):
    n, C, HWp = out_bf16.shape
    T = ssum.shape[1]
    grid = (n, HWp // tp)
    kern = functools.partial(_gn_apply_kernel, count=float(count), eps=eps)
    stat_spec = pl.BlockSpec((1, T, C, 1), lambda i, j: (i, 0, 0, 0))
    return pl.pallas_call(
        kern,
        out_shape=jax.ShapeDtypeStruct((n, C, HWp), jnp.float32),
        grid=grid,
        in_specs=[
            pl.BlockSpec((1, C, tp), lambda i, j: (i, 0, j)),
            stat_spec, stat_spec,
            pl.BlockSpec((C, 1), lambda i, j: (0, 0)),
            pl.BlockSpec((C, 1), lambda i, j: (0, 0)),
        ],
        out_specs=pl.BlockSpec((1, C, tp), lambda i, j: (i, 0, j)),
        compiler_params=_cparams(("parallel", "parallel")),
    )(out_bf16, ssum, ssq,
      gamma.reshape(C, 1).astype(jnp.float32),
      beta.reshape(C, 1).astype(jnp.float32))


# ----------------------------------------------------------------------------
# Plain-JAX glue: positional encoding, flow->grid, bilinear flow-guided gather
# ----------------------------------------------------------------------------

def pos_en_sine_cm(num_pos_feats, h, w):
    """Sinusoidal positional encoding, channel-major: (2*npf, h*w) f32."""
    scale = 2.0 * math.pi
    temperature = 10000.0
    eps = 1e-6
    ones = jnp.ones((1, h, w), jnp.float32)
    y_embed = jnp.cumsum(ones, axis=1)
    x_embed = jnp.cumsum(ones, axis=2)
    y_embed = y_embed / (y_embed[:, -1:, :] + eps) * scale
    x_embed = x_embed / (x_embed[:, :, -1:] + eps) * scale
    dim_t = jnp.arange(num_pos_feats, dtype=jnp.float32)
    dim_t = temperature ** (2.0 * jnp.floor(dim_t / 2.0) / num_pos_feats)
    pos_x = x_embed[:, :, :, None] / dim_t
    pos_y = y_embed[:, :, :, None] / dim_t
    pos_x = jnp.stack(
        (jnp.sin(pos_x[:, :, :, 0::2]), jnp.cos(pos_x[:, :, :, 1::2])), axis=4
    ).reshape(1, h, w, num_pos_feats)
    pos_y = jnp.stack(
        (jnp.sin(pos_y[:, :, :, 0::2]), jnp.cos(pos_y[:, :, :, 1::2])), axis=4
    ).reshape(1, h, w, num_pos_feats)
    pos = jnp.concatenate((pos_y, pos_x), axis=3)             # (1, h, w, 2*npf)
    return jnp.transpose(pos, (0, 3, 1, 2)).reshape(2 * num_pos_feats, h * w)


def flow_to_grid(flow, k_size=5):
    """flow: (n, 2, h, w) -> vgrid scaled to [-1,1], shape (n, k^2, h, w, 2)."""
    n, _, h, w = flow.shape
    padding = (k_size - 1) // 2
    grid_y, grid_x = jnp.meshgrid(
        jnp.arange(h, dtype=jnp.float32), jnp.arange(w, dtype=jnp.float32),
        indexing="ij")
    grid_y = jnp.broadcast_to(grid_y[None], (k_size ** 2, h, w))
    grid_x = jnp.broadcast_to(grid_x[None], (k_size ** 2, h, w))
    shift = jnp.arange(k_size, dtype=jnp.float32) - padding
    shift_y, shift_x = jnp.meshgrid(shift, shift, indexing="ij")
    shift_y = jnp.broadcast_to(shift_y.reshape(-1, 1, 1), (k_size ** 2, h, w))
    shift_x = jnp.broadcast_to(shift_x.reshape(-1, 1, 1), (k_size ** 2, h, w))
    samples_y = grid_y + shift_y
    samples_x = grid_x + shift_x
    samples_grid = jnp.stack((samples_x, samples_y), axis=3)        # (k^2,h,w,2)
    samples_grid = jnp.broadcast_to(samples_grid[None],
                                    (n, k_size ** 2, h, w, 2))
    flow_p = jnp.transpose(flow, (0, 2, 3, 1))[:, None]             # (n,1,h,w,2)
    vgrid = samples_grid + flow_p
    vgrid_x = 2.0 * vgrid[..., 0] / max(w - 1, 1) - 1.0
    vgrid_y = 2.0 * vgrid[..., 1] / max(h - 1, 1) - 1.0
    return jnp.stack((vgrid_x, vgrid_y), axis=4)                    # (n,k^2,h,w,2)


# TODO(synk): data-dependent bilinear gather (F.grid_sample, zeros padding,
# align_corners=True) stays in XLA: Pallas TPU has no guaranteed-lowerable
# in-kernel gather for arbitrary per-pixel lane indices.  bf16 source + bf16
# result halves its HBM traffic; it samples directly from the (n, C, HW)
# projection (no 25x source replication).
def flow_guided_gather(feat_cm, vgrid, H, W):
    n, C, _ = feat_cm.shape
    k2 = vgrid.shape[1]
    L = k2 * H * W
    gx = (vgrid[..., 0] + 1.0) * 0.5 * (W - 1)      # (n, k2, h, w)
    gy = (vgrid[..., 1] + 1.0) * 0.5 * (H - 1)
    x0 = jnp.floor(gx)
    y0 = jnp.floor(gy)
    x1 = x0 + 1.0
    y1 = y0 + 1.0
    wx1 = gx - x0
    wx0 = 1.0 - wx1
    wy1 = gy - y0
    wy0 = 1.0 - wy1

    def corner(xi, yi, wgt):
        valid = ((xi >= 0) & (xi <= W - 1) & (yi >= 0) & (yi <= H - 1))
        valid = valid.astype(jnp.float32)
        xc = jnp.clip(xi, 0, W - 1).astype(jnp.int32)
        yc = jnp.clip(yi, 0, H - 1).astype(jnp.int32)
        idx = (yc * W + xc).reshape(n, 1, L)
        idx = jnp.broadcast_to(idx, (n, C, L))
        g = jnp.take_along_axis(feat_cm, idx, axis=2).astype(jnp.float32)
        return g * (wgt * valid).reshape(n, 1, L)

    out = (corner(x0, y0, wx0 * wy0) + corner(x1, y0, wx1 * wy0)
           + corner(x0, y1, wx0 * wy1) + corner(x1, y1, wx1 * wy1))
    return out.reshape(n, C, k2, H * W).astype(jnp.bfloat16)


# ----------------------------------------------------------------------------
# Parameters + TransformerUnit forward
# ----------------------------------------------------------------------------

def init_params(key, feat_dim, mlp_ratio=2):
    hidden = int(feat_dim * mlp_ratio)
    ks = jax.random.split(key, 8)

    def w(k, out_c, in_c):
        return jax.random.normal(k, (out_c, in_c), jnp.float32) / math.sqrt(in_c)

    return {
        "w_qs": w(ks[0], feat_dim, feat_dim),      # Conv2d 1x1 weight (Cout, Cin), no bias
        "w_ks": w(ks[1], feat_dim, feat_dim),
        "w_vs": w(ks[2], feat_dim, feat_dim),
        "fc": w(ks[3], feat_dim, feat_dim),
        "mlp_w1": w(ks[4], hidden, feat_dim),
        "mlp_b1": 0.01 * jax.random.normal(ks[5], (hidden,), jnp.float32),
        "mlp_w2": w(ks[6], feat_dim, hidden),
        "mlp_b2": 0.01 * jax.random.normal(ks[7], (feat_dim,), jnp.float32),
        "gn_gamma": jnp.ones((feat_dim,), jnp.float32),
        "gn_beta": jnp.zeros((feat_dim,), jnp.float32),
    }


def transformer_unit_forward(q, k, v, flow, params, *, n_head=4, k_size=5,
                             pos_en_flag=True):
    """q,k,v: (N, C, H, W) f32; flow: (N, 2, H, W). Returns (N, C, H, W) f32."""
    n, c, h, w = q.shape
    assert k.shape == q.shape and v.shape == q.shape
    # TODO(synk): resize_flow branch not needed (matching spatial sizes here).
    assert flow.shape == (n, 2, h, w)
    assert c % n_head == 0
    d_k = d_v = c // n_head
    HW = h * w
    tp, HWp = _pick_tile(HW, _CFG["pixel_tile"])

    def pad_px(x):
        if HWp == HW:
            return x
        return jnp.pad(x, [(0, 0)] * (x.ndim - 1) + [(0, HWp - HW)])

    # NCHW -> (n, C, H*W) channel-major: a free reshape (no transpose).
    q_cm = pad_px(q.reshape(n, c, HW).astype(jnp.float32))
    k_cm = pad_px(k.reshape(n, c, HW).astype(jnp.float32))
    v_cm = pad_px(v.reshape(n, c, HW).astype(jnp.float32))

    if pos_en_flag:
        pos = pad_px(pos_en_sine_cm(c // 2, h, w))   # (c, HWp); shared by q and k
    else:
        pos = jnp.zeros((c, HWp), jnp.float32)

    # Kernel 1: fused QKV projections + shared pos add (k/v emitted in bf16).
    q_proj, k_proj, v_proj = qkv_proj_pallas(
        q_cm, k_cm, v_cm, pos,
        params["w_qs"], params["w_ks"], params["w_vs"], tp=tp)

    # Flow-guided k^2 bilinear sampling (XLA gather on the bf16 projections).
    vgrid = flow_to_grid(flow, k_size)                              # (n,k2,h,w,2)
    k_src = k_proj[..., :HW] if HWp != HW else k_proj
    v_src = v_proj[..., :HW] if HWp != HW else v_proj
    samp_k = pad_px(flow_guided_gather(k_src, vgrid, h, w))         # (n,C,K2,HWp) bf16
    samp_v = pad_px(flow_guided_gather(v_src, vgrid, h, w))

    # Kernel 2 (fused): attention + fc + MLP + residual + GN partial stats.
    out_unnorm, ssum, ssq = attn_mlp_stats_pallas(
        q_proj, samp_k, samp_v, params, n_head=n_head, d_k=d_k, d_v=d_v,
        tp=tp, hw_real=HW)

    # Kernel 3: GroupNorm(1, C) apply.
    out = gn_apply_pallas(out_unnorm, ssum, ssq, params["gn_gamma"],
                          params["gn_beta"], tp=tp, count=c * HW)

    if HWp != HW:
        out = out[..., :HW]
    return out.reshape(n, c, h, w)


if __name__ == "__main__":
    feat_dim, n_head, k_size, mlp_ratio = 16, 4, 5, 2
    N, H, W = 2, 8, 8

    key = jax.random.PRNGKey(0)
    kq, kk, kv, kf, kp = jax.random.split(key, 5)
    q = jax.random.normal(kq, (N, feat_dim, H, W), jnp.float32)
    k = jax.random.normal(kk, (N, feat_dim, H, W), jnp.float32)
    v = jax.random.normal(kv, (N, feat_dim, H, W), jnp.float32)
    flow = 2.0 * jax.random.normal(kf, (N, 2, H, W), jnp.float32)

    params = init_params(kp, feat_dim, mlp_ratio)

    fwd = jax.jit(functools.partial(transformer_unit_forward,
                                    n_head=n_head, k_size=k_size))
    out = fwd(q, k, v, flow, params)
    jax.block_until_ready(out)
    assert out.shape == (N, feat_dim, H, W)
    print("KERNEL_OK")
</pallas_src>

<mosaic_0001>
module attributes {stable_mosaic.version = 11 : i64} {
  func.func @_qkv_proj_kernel(%arg0: i32, %arg1: i32, %arg2: memref<1x16x64xf32, #tpu.memory_space<vmem>>, %arg3: memref<1x16x64xf32, #tpu.memory_space<vmem>>, %arg4: memref<1x16x64xf32, #tpu.memory_space<vmem>>, %arg5: memref<16x64xf32, #tpu.memory_space<vmem>>, %arg6: memref<16x16xbf16, #tpu.memory_space<vmem>>, %arg7: memref<16x16xbf16, #tpu.memory_space<vmem>>, %arg8: memref<16x16xbf16, #tpu.memory_space<vmem>>, %arg9: memref<1x16x64xf32, #tpu.memory_space<vmem>>, %arg10: memref<1x16x64xbf16, #tpu.memory_space<vmem>>, %arg11: memref<1x16x64xbf16, #tpu.memory_space<vmem>>) attributes {dimension_semantics = [#tpu.dimension_semantics<parallel>, #tpu.dimension_semantics<parallel>], iteration_bounds = array<i64: 2, 1>, scalar_prefetch = 0 : i64, scratch_operands = 0 : i64, tpu.core_type = #tpu.core_type<tc>, window_params = [{transform_indices = @transform_0, window_bounds = array<i64: 1, 16, 64>}, {transform_indices = @transform_1, window_bounds = array<i64: 1, 16, 64>}, {transform_indices = @transform_2, window_bounds = array<i64: 1, 16, 64>}, {transform_indices = @transform_3, window_bounds = array<i64: 16, 64>}, {pipeline_mode = #tpu.pipeline_mode<synchronous>, transform_indices = @transform_4, window_bounds = array<i64: 16, 16>}, {pipeline_mode = #tpu.pipeline_mode<synchronous>, transform_indices = @transform_5, window_bounds = array<i64: 16, 16>}, {pipeline_mode = #tpu.pipeline_mode<synchronous>, transform_indices = @transform_6, window_bounds = array<i64: 16, 16>}, {transform_indices = @transform_7, window_bounds = array<i64: 1, 16, 64>}, {transform_indices = @transform_8, window_bounds = array<i64: 1, 16, 64>}, {transform_indices = @transform_9, window_bounds = array<i64: 1, 16, 64>}]} {
    %c0 = arith.constant 0 : index
    %c0_0 = arith.constant 0 : index
    %0 = vector.load %arg5[%c0, %c0_0] : memref<16x64xf32, #tpu.memory_space<vmem>>, vector<16x64xf32>
    %c0_1 = arith.constant 0 : index
    %c0_2 = arith.constant 0 : index
    %c0_3 = arith.constant 0 : index
    %1 = vector.load %arg2[%c0_1, %c0_2, %c0_3] : memref<1x16x64xf32, #tpu.memory_space<vmem>>, vector<1x16x64xf32>
    %2 = vector.shape_cast %1 : vector<1x16x64xf32> to vector<16x64xf32>
    %3 = arith.addf %2, %0 : vector<16x64xf32>
    %4 = arith.truncf %3 : vector<16x64xf32> to vector<16x64xbf16>
    %c0_4 = arith.constant 0 : index
    %c0_5 = arith.constant 0 : index
    %c0_6 = arith.constant 0 : index
    %5 = vector.load %arg3[%c0_4, %c0_5, %c0_6] : memref<1x16x64xf32, #tpu.memory_space<vmem>>, vector<1x16x64xf32>
    %6 = vector.shape_cast %5 : vector<1x16x64xf32> to vector<16x64xf32>
    %7 = arith.addf %6, %0 : vector<16x64xf32>
    %8 = arith.truncf %7 : vector<16x64xf32> to vector<16x64xbf16>
    %c0_7 = arith.constant 0 : index
    %c0_8 = arith.constant 0 : index
    %c0_9 = arith.constant 0 : index
    %9 = vector.load %arg4[%c0_7, %c0_8, %c0_9] : memref<1x16x64xf32, #tpu.memory_space<vmem>>, vector<1x16x64xf32>
    %10 = vector.shape_cast %9 : vector<1x16x64xf32> to vector<16x64xf32>
    %11 = arith.truncf %10 : vector<16x64xf32> to vector<16x64xbf16>
    %c0_10 = arith.constant 0 : index
    %c0_11 = arith.constant 0 : index
    %12 = vector.load %arg6[%c0_10, %c0_11] : memref<16x16xbf16, #tpu.memory_space<vmem>>, vector<16x16xbf16>
    %cst = arith.constant dense<0.000000e+00> : vector<16x64xf32>
    %13 = tpu.matmul %12, %4, %cst {dimension_numbers = #tpu.dot_dimension_numbers<[1], [0], [0], [1], [0, 0, 1, 1], [], []>} : vector<16x16xbf16>, vector<16x64xbf16>, vector<16x64xf32> -> vector<16x64xf32>
    %c0_12 = arith.constant 0 : index
    %c0_13 = arith.constant 0 : index
    %c0_14 = arith.constant 0 : index
    %14 = vector.load %arg9[%c0_12, %c0_13, %c0_14] : memref<1x16x64xf32, #tpu.memory_space<vmem>>, vector<1x16x64xf32>
    %15 = vector.shape_cast %14 : vector<1x16x64xf32> to vector<16x64xf32>
    %16 = vector.shape_cast %13 : vector<16x64xf32> to vector<1x16x64xf32>
    tpu.vector_store %arg9[%c0_12, %c0_13, %c0_14], %16 {strides = array<i32>} : memref<1x16x64xf32, #tpu.memory_space<vmem>>, vector<1x16x64xf32>,
    %c0_15 = arith.constant 0 : index
    %c0_16 = arith.constant 0 : index
    %17 = vector.load %arg7[%c0_15, %c0_16] : memref<16x16xbf16, #tpu.memory_space<vmem>>, vector<16x16xbf16>
    %cst_17 = arith.constant dense<0.000000e+00> : vector<16x64xf32>
    %18 = tpu.matmul %17, %8, %cst_17 {dimension_numbers = #tpu.dot_dimension_numbers<[1], [0], [0], [1], [0, 0, 1, 1], [], []>} : vector<16x16xbf16>, vector<16x64xbf16>, vector<16x64xf32> -> vector<16x64xf32>
    %19 = arith.truncf %18 : vector<16x64xf32> to vector<16x64xbf16>
    %c0_18 = arith.constant 0 : index
    %c0_19 = arith.constant 0 : index
    %c0_20 = arith.constant 0 : index
    %20 = vector.load %arg10[%c0_18, %c0_19, %c0_20] : memref<1x16x64xbf16, #tpu.memory_space<vmem>>, vector<1x16x64xbf16>
    %21 = vector.shape_cast %20 : vector<1x16x64xbf16> to vector<16x64xbf16>
    %22 = vector.shape_cast %19 : vector<16x64xbf16> to vector<1x16x64xbf16>
    tpu.vector_store %arg10[%c0_18, %c0_19, %c0_20], %22 {strides = array<i32>} : memref<1x16x64xbf16, #tpu.memory_space<vmem>>, vector<1x16x64xbf16>,
    %c0_21 = arith.constant 0 : index
    %c0_22 = arith.constant 0 : index
    %23 = vector.load %arg8[%c0_21, %c0_22] : memref<16x16xbf16, #tpu.memory_space<vmem>>, vector<16x16xbf16>
    %cst_23 = arith.constant dense<0.000000e+00> : vector<16x64xf32>
    %24 = tpu.matmul %23, %11, %cst_23 {dimension_numbers = #tpu.dot_dimension_numbers<[1], [0], [0], [1], [0, 0, 1, 1], [], []>} : vector<16x16xbf16>, vector<16x64xbf16>, vector<16x64xf32> -> vector<16x64xf32>
    %25 = arith.truncf %24 : vector<16x64xf32> to vector<16x64xbf16>
    %c0_24 = arith.constant 0 : index
    %c0_25 = arith.constant 0 : index
    %c0_26 = arith.constant 0 : index
    %26 = vector.load %arg11[%c0_24, %c0_25, %c0_26] : memref<1x16x64xbf16, #tpu.memory_space<vmem>>, vector<1x16x64xbf16>
    %27 = vector.shape_cast %26 : vector<1x16x64xbf16> to vector<16x64xbf16>
    %28 = vector.shape_cast %25 : vector<16x64xbf16> to vector<1x16x64xbf16>
    tpu.vector_store %arg11[%c0_24, %c0_25, %c0_26], %28 {strides = array<i32>} : memref<1x16x64xbf16, #tpu.memory_space<vmem>>, vector<1x16x64xbf16>,
    return
  }
  func.func @transform_0(%arg0: i32, %arg1: i32) -> (i32, i32, i32) {
    %c0_i32 = arith.constant 0 : i32
    %c0_i32_0 = arith.constant 0 : i32
    return %arg0, %c0_i32, %arg1 : i32, i32, i32
  }
  func.func @transform_1(%arg0: i32, %arg1: i32) -> (i32, i32, i32) {
    %c0_i32 = arith.constant 0 : i32
    %c0_i32_0 = arith.constant 0 : i32
    return %arg0, %c0_i32, %arg1 : i32, i32, i32
  }
  func.func @transform_2(%arg0: i32, %arg1: i32) -> (i32, i32, i32) {
    %c0_i32 = arith.constant 0 : i32
    %c0_i32_0 = arith.constant 0 : i32
    return %arg0, %c0_i32, %arg1 : i32, i32, i32
  }
  func.func @transform_3(%arg0: i32, %arg1: i32) -> (i32, i32) {
    %c0_i32 = arith.constant 0 : i32
    %c0_i32_0 = arith.constant 0 : i32
    return %c0_i32, %arg1 : i32, i32
  }
  func.func @transform_4(%arg0: i32, %arg1: i32) -> (i32, i32) {
    %c0_i32 = arith.constant 0 : i32
    %c0_i32_0 = arith.constant 0 : i32
    %c0_i32_1 = arith.constant 0 : i32
    return %c0_i32, %c0_i32_0 : i32, i32
  }
  func.func @transform_5(%arg0: i32, %arg1: i32) -> (i32, i32) {
    %c0_i32 = arith.constant 0 : i32
    %c0_i32_0 = arith.constant 0 : i32
    %c0_i32_1 = arith.constant 0 : i32
    return %c0_i32, %c0_i32_0 : i32, i32
  }
  func.func @transform_6(%arg0: i32, %arg1: i32) -> (i32, i32) {
    %c0_i32 = arith.constant 0 : i32
    %c0_i32_0 = arith.constant 0 : i32
    %c0_i32_1 = arith.constant 0 : i32
    return %c0_i32, %c0_i32_0 : i32, i32
  }
  func.func @transform_7(%arg0: i32, %arg1: i32) -> (i32, i32, i32) {
    %c0_i32 = arith.constant 0 : i32
    %c0_i32_0 = arith.constant 0 : i32
    return %arg0, %c0_i32, %arg1 : i32, i32, i32
  }
  func.func @transform_8(%arg0: i32, %arg1: i32) -> (i32, i32, i32) {
    %c0_i32 = arith.constant 0 : i32
    %c0_i32_0 = arith.constant 0 : i32
    return %arg0, %c0_i32, %arg1 : i32, i32, i32
  }
  func.func @transform_9(%arg0: i32, %arg1: i32) -> (i32, i32, i32) {
    %c0_i32 = arith.constant 0 : i32
    %c0_i32_0 = arith.constant 0 : i32
    return %arg0, %c0_i32, %arg1 : i32, i32, i32
  }
}

module attributes {stable_mosaic.version = 11 : i64} {
  func.func @_attn_mlp_stats_kernel(%arg0: i32, %arg1: i32, %arg2: memref<1x16x64xf32, #tpu.memory_space<vmem>>, %arg3: memref<1x16x25x64xbf16, #tpu.memory_space<vmem>>, %arg4: memref<1x16x25x64xbf16, #tpu.memory_space<vmem>>, %arg5: memref<16x16xbf16, #tpu.memory_space<vmem>>, %arg6: memref<32x16xbf16, #tpu.memory_space<vmem>>, %arg7: memref<32x1xf32, #tpu.memory_space<vmem>>, %arg8: memref<16x32xbf16, #tpu.memory_space<vmem>>, %arg9: memref<16x1xf32, #tpu.memory_space<vmem>>, %arg10: memref<1x16x64xbf16, #tpu.memory_space<vmem>>, %arg11: memref<1x1x16x1xf32, #tpu.memory_space<vmem>>, %arg12: memref<1x1x16x1xf32, #tpu.memory_space<vmem>>) attributes {dimension_semantics = [#tpu.dimension_semantics<parallel>, #tpu.dimension_semantics<parallel>], iteration_bounds = array<i64: 2, 1>, scalar_prefetch = 0 : i64, scratch_operands = 0 : i64, tpu.core_type = #tpu.core_type<tc>, window_params = [{transform_indices = @transform_0, window_bounds = array<i64: 1, 16, 64>}, {transform_indices = @transform_1, window_bounds = array<i64: 1, 16, 25, 64>}, {transform_indices = @transform_2, window_bounds = array<i64: 1, 16, 25, 64>}, {pipeline_mode = #tpu.pipeline_mode<synchronous>, transform_indices = @transform_3, window_bounds = array<i64: 16, 16>}, {pipeline_mode = #tpu.pipeline_mode<synchronous>, transform_indices = @transform_4, window_bounds = array<i64: 32, 16>}, {pipeline_mode = #tpu.pipeline_mode<synchronous>, transform_indices = @transform_5, window_bounds = array<i64: 32, 1>}, {pipeline_mode = #tpu.pipeline_mode<synchronous>, transform_indices = @transform_6, window_bounds = array<i64: 16, 32>}, {pipeline_mode = #tpu.pipeline_mode<synchronous>, transform_indices = @transform_7, window_bounds = array<i64: 16, 1>}, {transform_indices = @transform_8, window_bounds = array<i64: 1, 16, 64>}, {transform_indices = @transform_9, window_bounds = array<i64: 1, 1, 16, 1>}, {transform_indices = @transform_10, window_bounds = array<i64: 1, 1, 16, 1>}]} {
    %c0 = arith.constant 0 : index
    %c0_0 = arith.constant 0 : index
    %c0_1 = arith.constant 0 : index
    %0 = vector.load %arg2[%c0, %c0_0, %c0_1] : memref<1x16x64xf32, #tpu.memory_space<vmem>>, vector<1x16x64xf32>
    %1 = vector.shape_cast %0 : vector<1x16x64xf32> to vector<16x64xf32>
    %2 = vector.extract_strided_slice %1 {offsets = [0, 0], sizes = [4, 64], strides = [1, 1]} : vector<16x64xf32> to vector<4x64xf32>
    %cst = arith.constant 5.000000e-01 : f32
    %3 = vector.broadcast %cst : f32 to vector<4x64xf32>
    %4 = arith.mulf %2, %3 : vector<4x64xf32>
    %c0_2 = arith.constant 0 : index
    %c0_3 = arith.constant 0 : index
    %c0_4 = arith.constant 0 : index
    %c0_5 = arith.constant 0 : index
    %5 = vector.load %arg3[%c0_2, %c0_3, %c0_4, %c0_5] : memref<1x16x25x64xbf16, #tpu.memory_space<vmem>>, vector<1x4x25x64xbf16>
    %6 = vector.shape_cast %5 : vector<1x4x25x64xbf16> to vector<4x25x64xbf16>
    %7 = arith.extf %6 : vector<4x25x64xbf16> to vector<4x25x64xf32>
    %8 = vector.shape_cast %4 : vector<4x64xf32> to vector<4x1x64xf32>
    %9 = vector.broadcast %8 : vector<4x1x64xf32> to vector<4x25x64xf32>
    %10 = arith.mulf %9, %7 : vector<4x25x64xf32>
    %cst_6 = arith.constant dense<0.000000e+00> : vector<25x64xf32>
    %11 = vector.multi_reduction <add>, %10, %cst_6 [0] : vector<4x25x64xf32> to vector<25x64xf32>
    %cst_7 = arith.constant dense<0xFF800000> : vector<64xf32>
    %12 = vector.multi_reduction <maximumf>, %11, %cst_7 [0] : vector<25x64xf32> to vector<64xf32>
    %13 = vector.shape_cast %12 : vector<64xf32> to vector<1x64xf32>
    %14 = vector.broadcast %13 : vector<1x64xf32> to vector<25x64xf32>
    %15 = arith.subf %11, %14 : vector<25x64xf32>
    %16 = math.exp %15 : vector<25x64xf32>
    %cst_8 = arith.constant dense<0.000000e+00> : vector<64xf32>
    %17 = vector.multi_reduction <add>, %16, %cst_8 [0] : vector<25x64xf32> to vector<64xf32>
    %18 = vector.shape_cast %17 : vector<64xf32> to vector<1x64xf32>
    %19 = tpu.reciprocal %18 {approx = true} : vector<1x64xf32> -> vector<1x64xf32>
    %20 = vector.broadcast %19 : vector<1x64xf32> to vector<25x64xf32>
    %21 = arith.mulf %16, %20 : vector<25x64xf32>
    %c0_9 = arith.constant 0 : index
    %c0_10 = arith.constant 0 : index
    %c0_11 = arith.constant 0 : index
    %c0_12 = arith.constant 0 : index
    %22 = vector.load %arg4[%c0_9, %c0_10, %c0_11, %c0_12] : memref<1x16x25x64xbf16, #tpu.memory_space<vmem>>, vector<1x4x25x64xbf16>
    %23 = vector.shape_cast %22 : vector<1x4x25x64xbf16> to vector<4x25x64xbf16>
    %24 = arith.extf %23 : vector<4x25x64xbf16> to vector<4x25x64xf32>
    %25 = vector.shape_cast %21 : vector<25x64xf32> to vector<1x25x64xf32>
    %26 = vector.broadcast %25 : vector<1x25x64xf32> to vector<4x25x64xf32>
    %27 = arith.mulf %26, %24 : vector<4x25x64xf32>
    %cst_13 = arith.constant dense<0.000000e+00> : vector<4x64xf32>
    %28 = vector.multi_reduction <add>, %27, %cst_13 [1] : vector<4x25x64xf32> to vector<4x64xf32>
    %29 = vector.extract_strided_slice %1 {offsets = [4, 0], sizes = [4, 64], strides = [1, 1]} : vector<16x64xf32> to vector<4x64xf32>
    %cst_14 = arith.constant 5.000000e-01 : f32
    %30 = vector.broadcast %cst_14 : f32 to vector<4x64xf32>
    %31 = arith.mulf %29, %30 : vector<4x64xf32>
    %c0_15 = arith.constant 0 : index
    %c4 = arith.constant 4 : index
    %c0_16 = arith.constant 0 : index
    %c0_17 = arith.constant 0 : index
    %32 = vector.load %arg3[%c0_15, %c4, %c0_16, %c0_17] : memref<1x16x25x64xbf16, #tpu.memory_space<vmem>>, vector<1x4x25x64xbf16>
    %33 = vector.shape_cast %32 : vector<1x4x25x64xbf16> to vector<4x25x64xbf16>
    %34 = arith.extf %33 : vector<4x25x64xbf16> to vector<4x25x64xf32>
    %35 = vector.shape_cast %31 : vector<4x64xf32> to vector<4x1x64xf32>
    %36 = vector.broadcast %35 : vector<4x1x64xf32> to vector<4x25x64xf32>
    %37 = arith.mulf %36, %34 : vector<4x25x64xf32>
    %cst_18 = arith.constant dense<0.000000e+00> : vector<25x64xf32>
    %38 = vector.multi_reduction <add>, %37, %cst_18 [0] : vector<4x25x64xf32> to vector<25x64xf32>
    %cst_19 = arith.constant dense<0xFF800000> : vector<64xf32>
    %39 = vector.multi_reduction <maximumf>, %38, %cst_19 [0] : vector<25x64xf32> to vector<64xf32>
    %40 = vector.shape_cast %39 : vector<64xf32> to vector<1x64xf32>
    %41 = vector.broadcast %40 : vector<1x64xf32> to vector<25x64xf32>
    %42 = arith.subf %38, %41 : vector<25x64xf32>
    %43 = math.exp %42 : vector<25x64xf32>
    %cst_20 = arith.constant dense<0.000000e+00> : vector<64xf32>
    %44 = vector.multi_reduction <add>, %43, %cst_20 [0] : vector<25x64xf32> to vector<64xf32>
    %45 = vector.shape_cast %44 : vector<64xf32> to vector<1x64xf32>
    %46 = tpu.reciprocal %45 {approx = true} : vector<1x64xf32> -> vector<1x64xf32>
    %47 = vector.broadcast %46 : vector<1x64xf32> to vector<25x64xf32>
    %48 = arith.mulf %43, %47 : vector<25x64xf32>
    %c0_21 = arith.constant 0 : index
    %c4_22 = arith.constant 4 : index
    %c0_23 = arith.constant 0 : index
    %c0_24 = arith.constant 0 : index
    %49 = vector.load %arg4[%c0_21, %c4_22, %c0_23, %c0_24] : memref<1x16x25x64xbf16, #tpu.memory_space<vmem>>, vector<1x4x25x64xbf16>
    %50 = vector.shape_cast %49 : vector<1x4x25x64xbf16> to vector<4x25x64xbf16>
    %51 = arith.extf %50 : vector<4x25x64xbf16> to vector<4x25x64xf32>
    %52 = vector.shape_cast %48 : vector<25x64xf32> to vector<1x25x64xf32>
    %53 = vector.broadcast %52 : vector<1x25x64xf32> to vector<4x25x64xf32>
    %54 = arith.mulf %53, %51 : vector<4x25x64xf32>
    %cst_25 = arith.constant dense<0.000000e+00> : vector<4x64xf32>
    %55 = vector.multi_reduction <add>, %54, %cst_25 [1] : vector<4x25x64xf32> to vector<4x64xf32>
    %56 = vector.extract_strided_slice %1 {offsets = [8, 0], sizes = [4, 64], strides = [1, 1]} : vector<16x64xf32> to vector<4x64xf32>
    %cst_26 = arith.constant 5.000000e-01 : f32
    %57 = vector.broadcast %cst_26 : f32 to vector<4x64xf32>
    %58 = arith.mulf %56, %57 : vector<4x64xf32>
    %c0_27 = arith.constant 0 : index
    %c8 = arith.constant 8 : index
    %c0_28 = arith.constant 0 : index
    %c0_29 = arith.constant 0 : index
    %59 = vector.load %arg3[%c0_27, %c8, %c0_28, %c0_29] : memref<1x16x25x64xbf16, #tpu.memory_space<vmem>>, vector<1x4x25x64xbf16>
    %60 = vector.shape_cast %59 : vector<1x4x25x64xbf16> to vector<4x25x64xbf16>
    %61 = arith.extf %60 : vector<4x25x64xbf16> to vector<4x25x64xf32>
    %62 = vector.shape_cast %58 : vector<4x64xf32> to vector<4x1x64xf32>
    %63 = vector.broadcast %62 : vector<4x1x64xf32> to vector<4x25x64xf32>
    %64 = arith.mulf %63, %61 : vector<4x25x64xf32>
    %cst_30 = arith.constant dense<0.000000e+00> : vector<25x64xf32>
    %65 = vector.multi_reduction <add>, %64, %cst_30 [0] : vector<4x25x64xf32> to vector<25x64xf32>
    %cst_31 = arith.constant dense<0xFF800000> : vector<64xf32>
    %66 = vector.multi_reduction <maximumf>, %65, %cst_31 [0] : vector<25x64xf32> to vector<64xf32>
    %67 = vector.shape_cast %66 : vector<64xf32> to vector<1x64xf32>
    %68 = vector.broadcast %67 : vector<1x64xf32> to vector<25x64xf32>
    %69 = arith.subf %65, %68 : vector<25x64xf32>
    %70 = math.exp %69 : vector<25x64xf32>
    %cst_32 = arith.constant dense<0.000000e+00> : vector<64xf32>
    %71 = vector.multi_reduction <add>, %70, %cst_32 [0] : vector<25x64xf32> to vector<64xf32>
    %72 = vector.shape_cast %71 : vector<64xf32> to vector<1x64xf32>
    %73 = tpu.reciprocal %72 {approx = true} : vector<1x64xf32> -> vector<1x64xf32>
    %74 = vector.broadcast %73 : vector<1x64xf32> to vector<25x64xf32>
    %75 = arith.mulf %70, %74 : vector<25x64xf32>
    %c0_33 = arith.constant 0 : index
    %c8_34 = arith.constant 8 : index
    %c0_35 = arith.constant 0 : index
    %c0_36 = arith.constant 0 : index
    %76 = vector.load %arg4[%c0_33, %c8_34, %c0_35, %c0_36] : memref<1x16x25x64xbf16, #tpu.memory_space<vmem>>, vector<1x4x25x64xbf16>
    %77 = vector.shape_cast %76 : vector<1x4x25x64xbf16> to vector<4x25x64xbf16>
    %78 = arith.extf %77 : vector<4x25x64xbf16> to vector<4x25x64xf32>
    %79 = vector.shape_cast %75 : vector<25x64xf32> to vector<1x25x64xf32>
    %80 = vector.broadcast %79 : vector<1x25x64xf32> to vector<4x25x64xf32>
    %81 = arith.mulf %80, %78 : vector<4x25x64xf32>
    %cst_37 = arith.constant dense<0.000000e+00> : vector<4x64xf32>
    %82 = vector.multi_reduction <add>, %81, %cst_37 [1] : vector<4x25x64xf32> to vector<4x64xf32>
    %83 = vector.extract_strided_slice %1 {offsets = [12, 0], sizes = [4, 64], strides = [1, 1]} : vector<16x64xf32> to vector<4x64xf32>
    %cst_38 = arith.constant 5.000000e-01 : f32
    %84 = vector.broadcast %cst_38 : f32 to vector<4x64xf32>
    %85 = arith.mulf %83, %84 : vector<4x64xf32>
    %c0_39 = arith.constant 0 : index
    %c12 = arith.constant 12 : index
    %c0_40 = arith.constant 0 : index
    %c0_41 = arith.constant 0 : index
    %86 = vector.load %arg3[%c0_39, %c12, %c0_40, %c0_41] : memref<1x16x25x64xbf16, #tpu.memory_space<vmem>>, vector<1x4x25x64xbf16>
    %87 = vector.shape_cast %86 : vector<1x4x25x64xbf16> to vector<4x25x64xbf16>
    %88 = arith.extf %87 : vector<4x25x64xbf16> to vector<4x25x64xf32>
    %89 = vector.shape_cast %85 : vector<4x64xf32> to vector<4x1x64xf32>
    %90 = vector.broadcast %89 : vector<4x1x64xf32> to vector<4x25x64xf32>
    %91 = arith.mulf %90, %88 : vector<4x25x64xf32>
    %cst_42 = arith.constant dense<0.000000e+00> : vector<25x64xf32>
    %92 = vector.multi_reduction <add>, %91, %cst_42 [0] : vector<4x25x64xf32> to vector<25x64xf32>
    %cst_43 = arith.constant dense<0xFF800000> : vector<64xf32>
    %93 = vector.multi_reduction <maximumf>, %92, %cst_43 [0] : vector<25x64xf32> to vector<64xf32>
    %94 = vector.shape_cast %93 : vector<64xf32> to vector<1x64xf32>
    %95 = vector.broadcast %94 : vector<1x64xf32> to vector<25x64xf32>
    %96 = arith.subf %92, %95 : vector<25x64xf32>
    %97 = math.exp %96 : vector<25x64xf32>
    %cst_44 = arith.constant dense<0.000000e+00> : vector<64xf32>
    %98 = vector.multi_reduction <add>, %97, %cst_44 [0] : vector<25x64xf32> to vector<64xf32>
    %99 = vector.shape_cast %98 : vector<64xf32> to vector<1x64xf32>
    %100 = tpu.reciprocal %99 {approx = true} : vector<1x64xf32> -> vector<1x64xf32>
    %101 = vector.broadcast %100 : vector<1x64xf32> to vector<25x64xf32>
    %102 = arith.mulf %97, %101 : vector<25x64xf32>
    %c0_45 = arith.constant 0 : index
    %c12_46 = arith.constant 12 : index
    %c0_47 = arith.constant 0 : index
    %c0_48 = arith.constant 0 : index
    %103 = vector.load %arg4[%c0_45, %c12_46, %c0_47, %c0_48] : memref<1x16x25x64xbf16, #tpu.memory_space<vmem>>, vector<1x4x25x64xbf16>
    %104 = vector.shape_cast %103 : vector<1x4x25x64xbf16> to vector<4x25x64xbf16>
    %105 = arith.extf %104 : vector<4x25x64xbf16> to vector<4x25x64xf32>
    %106 = vector.shape_cast %102 : vector<25x64xf32> to vector<1x25x64xf32>
    %107 = vector.broadcast %106 : vector<1x25x64xf32> to vector<4x25x64xf32>
    %108 = arith.mulf %107, %105 : vector<4x25x64xf32>
    %cst_49 = arith.constant dense<0.000000e+00> : vector<4x64xf32>
    %109 = vector.multi_reduction <add>, %108, %cst_49 [1] : vector<4x25x64xf32> to vector<4x64xf32>
    %110 = tpu.concatenate %28, %55, %82, %109 in 0 : vector<4x64xf32>, vector<4x64xf32>, vector<4x64xf32>, vector<4x64xf32> -> vector<16x64xf32>
    %c0_50 = arith.constant 0 : index
    %c0_51 = arith.constant 0 : index
    %111 = vector.load %arg5[%c0_50, %c0_51] : memref<16x16xbf16, #tpu.memory_space<vmem>>, vector<16x16xbf16>
    %112 = arith.truncf %110 : vector<16x64xf32> to vector<16x64xbf16>
    %cst_52 = arith.constant dense<0.000000e+00> : vector<16x64xf32>
    %113 = tpu.matmul %111, %112, %cst_52 {dimension_numbers = #tpu.dot_dimension_numbers<[1], [0], [0], [1], [0, 0, 1, 1], [], []>} : vector<16x16xbf16>, vector<16x64xbf16>, vector<16x64xf32> -> vector<16x64xf32>
    %c0_53 = arith.constant 0 : index
    %c0_54 = arith.constant 0 : index
    %114 = vector.load %arg6[%c0_53, %c0_54] : memref<32x16xbf16, #tpu.memory_space<vmem>>, vector<32x16xbf16>
    %115 = arith.truncf %113 : vector<16x64xf32> to vector<16x64xbf16>
    %cst_55 = arith.constant dense<0.000000e+00> : vector<32x64xf32>
    %116 = tpu.matmul %114, %115, %cst_55 {dimension_numbers = #tpu.dot_dimension_numbers<[1], [0], [0], [1], [0, 0, 1, 1], [], []>} : vector<32x16xbf16>, vector<16x64xbf16>, vector<32x64xf32> -> vector<32x64xf32>
    %c0_56 = arith.constant 0 : index
    %c0_57 = arith.constant 0 : index
    %117 = vector.load %arg7[%c0_56, %c0_57] : memref<32x1xf32, #tpu.memory_space<vmem>>, vector<32x1xf32>
    %118 = vector.broadcast %117 : vector<32x1xf32> to vector<32x64xf32>
    %119 = arith.addf %116, %118 : vector<32x64xf32>
    %cst_58 = arith.constant 0.000000e+00 : f32
    %120 = vector.broadcast %cst_58 : f32 to vector<32x64xf32>
    %121 = arith.cmpf oge, %119, %120 : vector<32x64xf32>
    %cst_59 = arith.constant 2.000000e-01 : f32
    %122 = vector.broadcast %cst_59 : f32 to vector<32x64xf32>
    %123 = arith.mulf %122, %119 : vector<32x64xf32>
    %124 = arith.select %121, %119, %123 : vector<32x64xi1>, vector<32x64xf32>
    %c0_60 = arith.constant 0 : index
    %c0_61 = arith.constant 0 : index
    %125 = vector.load %arg8[%c0_60, %c0_61] : memref<16x32xbf16, #tpu.memory_space<vmem>>, vector<16x32xbf16>
    %126 = arith.truncf %124 : vector<32x64xf32> to vector<32x64xbf16>
    %cst_62 = arith.constant dense<0.000000e+00> : vector<16x64xf32>
    %127 = tpu.matmul %125, %126, %cst_62 {dimension_numbers = #tpu.dot_dimension_numbers<[1], [0], [0], [1], [0, 0, 1, 1], [], []>} : vector<16x32xbf16>, vector<32x64xbf16>, vector<16x64xf32> -> vector<16x64xf32>
    %c0_63 = arith.constant 0 : index
    %c0_64 = arith.constant 0 : index
    %128 = vector.load %arg9[%c0_63, %c0_64] : memref<16x1xf32, #tpu.memory_space<vmem>>, vector<16x1xf32>
    %129 = vector.broadcast %128 : vector<16x1xf32> to vector<16x64xf32>
    %130 = arith.addf %127, %129 : vector<16x64xf32>
    %131 = arith.addf %113, %130 : vector<16x64xf32>
    %132 = arith.truncf %131 : vector<16x64xf32> to vector<16x64xbf16>
    %c0_65 = arith.constant 0 : index
    %c0_66 = arith.constant 0 : index
    %c0_67 = arith.constant 0 : index
    %133 = vector.load %arg10[%c0_65, %c0_66, %c0_67] : memref<1x16x64xbf16, #tpu.memory_space<vmem>>, vector<1x16x64xbf16>
    %134 = vector.shape_cast %133 : vector<1x16x64xbf16> to vector<16x64xbf16>
    %135 = vector.shape_cast %132 : vector<16x64xbf16> to vector<1x16x64xbf16>
    tpu.vector_store %arg10[%c0_65, %c0_66, %c0_67], %135 {strides = array<i32>} : memref<1x16x64xbf16, #tpu.memory_space<vmem>>, vector<1x16x64xbf16>,
    %cst_68 = arith.constant dense<0.000000e+00> : vector<16xf32>
    %136 = vector.multi_reduction <add>, %131, %cst_68 [1] : vector<16x64xf32> to vector<16xf32>
    %137 = vector.shape_cast %136 : vector<16xf32> to vector<16x1xf32>
    %c0_69 = arith.constant 0 : index
    %c0_70 = arith.constant 0 : index
    %c0_71 = arith.constant 0 : index
    %c0_72 = arith.constant 0 : index
    %138 = vector.load %arg11[%c0_69, %c0_70, %c0_71, %c0_72] : memref<1x1x16x1xf32, #tpu.memory_space<vmem>>, vector<1x1x16x1xf32>
    %139 = vector.shape_cast %138 : vector<1x1x16x1xf32> to vector<16x1xf32>
    %140 = vector.shape_cast %137 : vector<16x1xf32> to vector<1x1x16x1xf32>
    tpu.vector_store %arg11[%c0_69, %c0_70, %c0_71, %c0_72], %140 {strides = array<i32>} : memref<1x1x16x1xf32, #tpu.memory_space<vmem>>, vector<1x1x16x1xf32>,
    %141 = arith.mulf %131, %131 : vector<16x64xf32>
    %cst_73 = arith.constant dense<0.000000e+00> : vector<16xf32>
    %142 = vector.multi_reduction <add>, %141, %cst_73 [1] : vector<16x64xf32> to vector<16xf32>
    %143 = vector.shape_cast %142 : vector<16xf32> to vector<16x1xf32>
    %c0_74 = arith.constant 0 : index
    %c0_75 = arith.constant 0 : index
    %c0_76 = arith.constant 0 : index
    %c0_77 = arith.constant 0 : index
    %144 = vector.load %arg12[%c0_74, %c0_75, %c0_76, %c0_77] : memref<1x1x16x1xf32, #tpu.memory_space<vmem>>, vector<1x1x16x1xf32>
    %145 = vector.shape_cast %144 : vector<1x1x16x1xf32> to vector<16x1xf32>
    %146 = vector.shape_cast %143 : vector<16x1xf32> to vector<1x1x16x1xf32>
    tpu.vector_store %arg12[%c0_74, %c0_75, %c0_76, %c0_77], %146 {strides = array<i32>} : memref<1x1x16x1xf32, #tpu.memory_space<vmem>>, vector<1x1x16x1xf32>,
    return
  }
  func.func @transform_0(%arg0: i32, %arg1: i32) -> (i32, i32, i32) {
    %c0_i32 = arith.constant 0 : i32
    %c0_i32_0 = arith.constant 0 : i32
    return %arg0, %c0_i32, %arg1 : i32, i32, i32
  }
  func.func @transform_1(%arg0: i32, %arg1: i32) -> (i32, i32, i32, i32) {
    %c0_i32 = arith.constant 0 : i32
    %c0_i32_0 = arith.constant 0 : i32
    %c0_i32_1 = arith.constant 0 : i32
    return %arg0, %c0_i32, %c0_i32_0, %arg1 : i32, i32, i32, i32
  }
  func.func @transform_2(%arg0: i32, %arg1: i32) -> (i32, i32, i32, i32) {
    %c0_i32 = arith.constant 0 : i32
    %c0_i32_0 = arith.constant 0 : i32
    %c0_i32_1 = arith.constant 0 : i32
    return %arg0, %c0_i32, %c0_i32_0, %arg1 : i32, i32, i32, i32
  }
  func.func @transform_3(%arg0: i32, %arg1: i32) -> (i32, i32) {
    %c0_i32 = arith.constant 0 : i32
    %c0_i32_0 = arith.constant 0 : i32
    %c0_i32_1 = arith.constant 0 : i32
    return %c0_i32, %c0_i32_0 : i32, i32
  }
  func.func @transform_4(%arg0: i32, %arg1: i32) -> (i32, i32) {
    %c0_i32 = arith.constant 0 : i32
    %c0_i32_0 = arith.constant 0 : i32
    %c0_i32_1 = arith.constant 0 : i32
    return %c0_i32, %c0_i32_0 : i32, i32
  }
  func.func @transform_5(%arg0: i32, %arg1: i32) -> (i32, i32) {
    %c0_i32 = arith.constant 0 : i32
    %c0_i32_0 = arith.constant 0 : i32
    %c0_i32_1 = arith.constant 0 : i32
    return %c0_i32, %c0_i32_0 : i32, i32
  }
  func.func @transform_6(%arg0: i32, %arg1: i32) -> (i32, i32) {
    %c0_i32 = arith.constant 0 : i32
    %c0_i32_0 = arith.constant 0 : i32
    %c0_i32_1 = arith.constant 0 : i32
    return %c0_i32, %c0_i32_0 : i32, i32
  }
  func.func @transform_7(%arg0: i32, %arg1: i32) -> (i32, i32) {
    %c0_i32 = arith.constant 0 : i32
    %c0_i32_0 = arith.constant 0 : i32
    %c0_i32_1 = arith.constant 0 : i32
    return %c0_i32, %c0_i32_0 : i32, i32
  }
  func.func @transform_8(%arg0: i32, %arg1: i32) -> (i32, i32, i32) {
    %c0_i32 = arith.constant 0 : i32
    %c0_i32_0 = arith.constant 0 : i32
    return %arg0, %c0_i32, %arg1 : i32, i32, i32
  }
  func.func @transform_9(%arg0: i32, %arg1: i32) -> (i32, i32, i32, i32) {
    %c0_i32 = arith.constant 0 : i32
    %c0_i32_0 = arith.constant 0 : i32
    %c0_i32_1 = arith.constant 0 : i32
    return %arg0, %arg1, %c0_i32, %c0_i32_0 : i32, i32, i32, i32
  }
  func.func @transform_10(%arg0: i32, %arg1: i32) -> (i32, i32, i32, i32) {
    %c0_i32 = arith.constant 0 : i32
    %c0_i32_0 = arith.constant 0 : i32
    %c0_i32_1 = arith.constant 0 : i32
    return %arg0, %arg1, %c0_i32, %c0_i32_0 : i32, i32, i32, i32
  }
}

module attributes {stable_mosaic.version = 11 : i64} {
  func.func @_gn_apply_kernel(%arg0: i32, %arg1: i32, %arg2: memref<1x16x64xbf16, #tpu.memory_space<vmem>>, %arg3: memref<1x1x16x1xf32, #tpu.memory_space<vmem>>, %arg4: memref<1x1x16x1xf32, #tpu.memory_space<vmem>>, %arg5: memref<16x1xf32, #tpu.memory_space<vmem>>, %arg6: memref<16x1xf32, #tpu.memory_space<vmem>>, %arg7: memref<1x16x64xf32, #tpu.memory_space<vmem>>) attributes {dimension_semantics = [#tpu.dimension_semantics<parallel>, #tpu.dimension_semantics<parallel>], iteration_bounds = array<i64: 2, 1>, scalar_prefetch = 0 : i64, scratch_operands = 0 : i64, tpu.core_type = #tpu.core_type<tc>, window_params = [{transform_indices = @transform_0, window_bounds = array<i64: 1, 16, 64>}, {transform_indices = @transform_1, window_bounds = array<i64: 1, 1, 16, 1>}, {transform_indices = @transform_2, window_bounds = array<i64: 1, 1, 16, 1>}, {pipeline_mode = #tpu.pipeline_mode<synchronous>, transform_indices = @transform_3, window_bounds = array<i64: 16, 1>}, {pipeline_mode = #tpu.pipeline_mode<synchronous>, transform_indices = @transform_4, window_bounds = array<i64: 16, 1>}, {transform_indices = @transform_5, window_bounds = array<i64: 1, 16, 64>}]} {
    %c0 = arith.constant 0 : index
    %c0_0 = arith.constant 0 : index
    %c0_1 = arith.constant 0 : index
    %0 = vector.load %arg2[%c0, %c0_0, %c0_1] : memref<1x16x64xbf16, #tpu.memory_space<vmem>>, vector<1x16x64xbf16>
    %1 = vector.shape_cast %0 : vector<1x16x64xbf16> to vector<16x64xbf16>
    %2 = arith.extf %1 : vector<16x64xbf16> to vector<16x64xf32>
    %c0_2 = arith.constant 0 : index
    %c0_3 = arith.constant 0 : index
    %c0_4 = arith.constant 0 : index
    %c0_5 = arith.constant 0 : index
    %3 = vector.load %arg3[%c0_2, %c0_3, %c0_4, %c0_5] : memref<1x1x16x1xf32, #tpu.memory_space<vmem>>, vector<1x1x16x1xf32>
    %4 = vector.shape_cast %3 : vector<1x1x16x1xf32> to vector<1x1x1x16x1xf32>
    %cst = arith.constant dense<0.000000e+00> : vector<1xf32>
    %5 = vector.multi_reduction <add>, %4, %cst [1, 2, 3, 4] : vector<1x1x1x16x1xf32> to vector<1xf32>
    %6 = vector.shape_cast %5 : vector<1xf32> to vector<1x1x1x1x1xf32>
    %7 = vector.extract %6[0, 0, 0, 0, 0] : f32 from vector<1x1x1x1x1xf32>
    %cst_6 = arith.constant 1.024000e+03 : f32
    %8 = arith.divf %7, %cst_6 : f32
    %c0_7 = arith.constant 0 : index
    %c0_8 = arith.constant 0 : index
    %c0_9 = arith.constant 0 : index
    %c0_10 = arith.constant 0 : index
    %9 = vector.load %arg4[%c0_7, %c0_8, %c0_9, %c0_10] : memref<1x1x16x1xf32, #tpu.memory_space<vmem>>, vector<1x1x16x1xf32>
    %10 = vector.shape_cast %9 : vector<1x1x16x1xf32> to vector<1x1x1x16x1xf32>
    %cst_11 = arith.constant dense<0.000000e+00> : vector<1xf32>
    %11 = vector.multi_reduction <add>, %10, %cst_11 [1, 2, 3, 4] : vector<1x1x1x16x1xf32> to vector<1xf32>
    %12 = vector.shape_cast %11 : vector<1xf32> to vector<1x1x1x1x1xf32>
    %13 = vector.extract %12[0, 0, 0, 0, 0] : f32 from vector<1x1x1x1x1xf32>
    %cst_12 = arith.constant 1.024000e+03 : f32
    %14 = arith.divf %13, %cst_12 : f32
    %15 = arith.mulf %8, %8 : f32
    %16 = arith.subf %14, %15 : f32
    %cst_13 = arith.constant 9.99999974E-6 : f32
    %17 = arith.addf %16, %cst_13 : f32
    %18 = math.rsqrt %17 : f32
    %19 = vector.broadcast %8 : f32 to vector<16x64xf32>
    %20 = arith.subf %2, %19 : vector<16x64xf32>
    %21 = vector.broadcast %18 : f32 to vector<16x64xf32>
    %22 = arith.mulf %20, %21 : vector<16x64xf32>
    %c0_14 = arith.constant 0 : index
    %c0_15 = arith.constant 0 : index
    %23 = vector.load %arg5[%c0_14, %c0_15] : memref<16x1xf32, #tpu.memory_space<vmem>>, vector<16x1xf32>
    %24 = vector.broadcast %23 : vector<16x1xf32> to vector<16x64xf32>
    %25 = arith.mulf %22, %24 : vector<16x64xf32>
    %c0_16 = arith.constant 0 : index
    %c0_17 = arith.constant 0 : index
    %26 = vector.load %arg6[%c0_16, %c0_17] : memref<16x1xf32, #tpu.memory_space<vmem>>, vector<16x1xf32>
    %27 = vector.broadcast %26 : vector<16x1xf32> to vector<16x64xf32>
    %28 = arith.addf %25, %27 : vector<16x64xf32>
    %c0_18 = arith.constant 0 : index
    %c0_19 = arith.constant 0 : index
    %c0_20 = arith.constant 0 : index
    %29 = vector.load %arg7[%c0_18, %c0_19, %c0_20] : memref<1x16x64xf32, #tpu.memory_space<vmem>>, vector<1x16x64xf32>
    %30 = vector.shape_cast %29 : vector<1x16x64xf32> to vector<16x64xf32>
    %31 = vector.shape_cast %28 : vector<16x64xf32> to vector<1x16x64xf32>
    tpu.vector_store %arg7[%c0_18, %c0_19, %c0_20], %31 {strides = array<i32>} : memref<1x16x64xf32, #tpu.memory_space<vmem>>, vector<1x16x64xf32>,
    return
  }
  func.func @transform_0(%arg0: i32, %arg1: i32) -> (i32, i32, i32) {
    %c0_i32 = arith.constant 0 : i32
    %c0_i32_0 = arith.constant 0 : i32
    return %arg0, %c0_i32, %arg1 : i32, i32, i32
  }
  func.func @transform_1(%arg0: i32, %arg1: i32) -> (i32, i32, i32, i32) {
    %c0_i32 = arith.constant 0 : i32
    %c0_i32_0 = arith.constant 0 : i32
    %c0_i32_1 = arith.constant 0 : i32
    %c0_i32_2 = arith.constant 0 : i32
    return %arg0, %c0_i32, %c0_i32_0, %c0_i32_1 : i32, i32, i32, i32
  }
  func.func @transform_2(%arg0: i32, %arg1: i32) -> (i32, i32, i32, i32) {
    %c0_i32 = arith.constant 0 : i32
    %c0_i32_0 = arith.constant 0 : i32
    %c0_i32_1 = arith.constant 0 : i32
    %c0_i32_2 = arith.constant 0 : i32
    return %arg0, %c0_i32, %c0_i32_0, %c0_i32_1 : i32, i32, i32, i32
  }
  func.func @transform_3(%arg0: i32, %arg1: i32) -> (i32, i32) {
    %c0_i32 = arith.constant 0 : i32
    %c0_i32_0 = arith.constant 0 : i32
    %c0_i32_1 = arith.constant 0 : i32
    return %c0_i32, %c0_i32_0 : i32, i32
  }
  func.func @transform_4(%arg0: i32, %arg1: i32) -> (i32, i32) {
    %c0_i32 = arith.constant 0 : i32
    %c0_i32_0 = arith.constant 0 : i32
    %c0_i32_1 = arith.constant 0 : i32
    return %c0_i32, %c0_i32_0 : i32, i32
  }
  func.func @transform_5(%arg0: i32, %arg1: i32) -> (i32, i32, i32) {
    %c0_i32 = arith.constant 0 : i32
    %c0_i32_0 = arith.constant 0 : i32
    return %arg0, %c0_i32, %arg1 : i32, i32, i32
  }
}

</mosaic_0001>

<bundles_post_ra>
// kernel: transformer_unit_forward.3
= control target key start
LH: loop header
LB: loop body
LE: loop exit
PB: predicated region body
PF: predicated region fallthrough
CT: control target
= control target key end

     0   :  { %15 = vsyncpa [#allocation3], 0  ;;  %s1331_s0 = inlined_call_operand.vmem [shape: f32[2,16,64], index: 0, kind: input, shape index: {}]   ;;  %s1332_s1 = inlined_call_operand.vmem [shape: f32[2,16,64], index: 1, kind: input, shape index: {}]   ;;  %s1333_s2 = inlined_call_operand.vmem [shape: f32[2,16,64], index: 2, kind: input, shape index: {}]   ;;  %s1334_s3 = inlined_call_operand.vmem [shape: f32[16,64], index: 3, kind: input, shape index: {}]   ;;  %s1335_s4 = inlined_call_operand.vmem [shape: bf16[16,16], index: 4, kind: input, shape index: {}]   ;;  %s1336_s5 = inlined_call_operand.vmem [shape: bf16[16,16], index: 5, kind: input, shape index: {}]   ;;  %s1337_s6 = inlined_call_operand.vmem [shape: bf16[16,16], index: 6, kind: input, shape index: {}]   ;;  %s1338_s7 = inlined_call_operand.hbm [shape: f32[2,16,64], index: 7, kind: output, shape index: {0}]   ;;  %s1339_s8 = inlined_call_operand.vmem [shape: bf16[2,16,64], index: 8, kind: output, shape index: {1}]   ;;  %s1340_s9 = inlined_call_operand.vmem [shape: bf16[2,16,64], index: 9, kind: output, shape index: {2}]  }
   0x1   :  { %17 = vsyncpa [#allocation3 + $0x1], 0  ;;  %s1169_s30 = smov 0   ;;  %s1171_s10 = smov 0  }
   0x2   :  { %s1173_s11 = smov 0   ;;  %s1175_s12 = smov 0  }
   0x3   :  { %s1177_s13 = smov 0   ;;  %s1179_s14 = smov 0  }
   0x4 LB: > { %1343 = sst [smem:[#allocation5_spill]] %s1108_s13  ;;  %s908_s15 = sadd.s32 4294967295, %s1112_s14   ;;  %s1112_s14 = sphi %s1179_s14, %s23_s14   ;;  %s1108_s13 = sphi %s1177_s13, %s1350_s13   ;;  %s1104_s12 = sphi %s1175_s12, %s1349_s12   ;;  %s1100_s11 = sphi %s1173_s11, %s1353_s11   ;;  %s1096_s10 = sphi %s1171_s10, %s1352_s10   ;;  %s1092_s30 = sphi %s1169_s30, %s1351_s30  }
   0x5   : > { %s909_s16 = sadd.s32 4294967294, %s1112_s14   ;;  %s35_s17 = sadd.s32 1, %s1108_s13 }
   0x6   : > { %s217_s18 = sadd.s32 1, %s1100_s11  ;;  %p37_p0 = scmp.ge.s32.totalorder %s35_s17, 2 }
   0x7   : > { %p227_p1 = scmp.ne.s32.totalorder %s1100_s11, %s1096_s10  ;;  %p228_p2 = scmp.eq.s32.totalorder %s908_s15, 1 }
   0x8   : > { %p233_p3 = scmp.ne.s32.totalorder %s1096_s10, %s1092_s30  ;;  %s1355_s17 = smov (%p37_p0, %s35_s17), 0 }
   0x9   : > { %1344 = sst [smem:[#allocation6_spill]] %s1355_s17  ;;  %p1209_p4 = por %p228_p2, %p227_p1 }
   0xa   : > { %p234_p5 = scmp.eq.s32.totalorder %s909_s16, 1  ;;  %s212_s20 = ssub.s32 %s1108_s13, %s1355_s17 }
   0xb   : > { %p913_p6 = scmp.ge.s32.totalorder %s1112_s14, 1  ;;  %p215_p7 = scmp.eq.s32.totalorder %s212_s20, 0 }
   0xc   : > { %p1216_p8 = por %p234_p5, %p233_p3  ;;  %p357_p9 = scmp.lt.s32.totalorder %s1112_s14, 3 }
   0xd   : > { %s1222_s22 = scalar_select %p215_p7, %s1100_s11, %s217_s18  }
   0xe   : > { %p358_p10 = pnand %p913_p6, %p357_p9 }
   0xf   : > { %1347 = sst [smem:[#allocation7_spill]] %s1222_s22  ;;  %p432_p11 = scmp.lt.s32.totalorder (!%p358_p10), %s1104_s12, 1 }
  0x10   : > { %361 = sbr.rel (%p358_p10) target bundleno = 251 (0xfb), region = 48  ;;  %s409_s28 = sand.u32 (!%p358_p10), 1, %s1096_s10  }
  0x11   : > { %s914_s29 = sshll.u32 (!%p358_p10), %s409_s28, 4  ;;  %s949_s20 = sshll.u32 (!%p358_p10), %s1104_s12, 8 }
  0x12   : > { %s1272_s22 = scalar_lea.hbm (!%p358_p10), %s1338_s7, %s949_s20 }
  0x15   : > { %v1114_v0 = vmov 0.0   ;;  %vm1115_vm0 = vmmov 0   ;;  %s1227_s23 = scalar_select %p432_p11, %s1104_s12, 1  ;;  %v477_v1 = vld [vmem:[%s1334_s3] sm:$0xff]  ;;  %v478_v2 = vld [vmem:[%s1334_s3 + $0x8] sm:$0xff]  ;;  %vm499_vm1 = vcmask 130048  }
  0x16   : > { %956 = vmatprep.subr.bf16.mxu0 %v1114_v0  ;;  %958 = vmatprep.mubr.msk.bf16.mxu0 %vm1115_vm0, %v1114_v0  ;;  %v1033_v14 = vld [vmem:[%s1335_s4] sm:$0xff]   ;;  %vm544_vm2 = vcmask 523264   ;;  %vm606_vm3 = vcmask 519168  }
  0x17   : > { %962 = vmatprep.subr.bf16.mxu1 %v1114_v0  ;;  %964 = vmatprep.mubr.msk.bf16.mxu1 %vm1115_vm0, %v1114_v0  ;;  %s940_s24 = sshll.u32 %s1227_s23, 4  ;;  %v1034_v17 = vld [vmem:[%s1336_s5] sm:$0xff]   ;;  %s943_s15 = sshll.u32 %s1227_s23, 3 }
  0x18   : > { %s439_s16 = scalar_lea.vmem %s1331_s0, %s940_s24  ;;  %s447_s17 = scalar_lea.vmem %s1332_s1, %s940_s24  ;;  %v1035_v18 = vld [vmem:[%s1337_s6] sm:$0xff]  }
  0x19   : > { %v479_v3 = vld [vmem:[%s439_s16] sm:$0xff]  ;;  %v480_v4 = vld [vmem:[%s439_s16 + $0x8] sm:$0xff]  ;;  %s455_s25 = scalar_lea.vmem %s1333_s2, %s940_s24  ;;  %s411_s16 = scalar_lea.vmem [#allocation2], %s914_s29 }
  0x1a   : > { %v484_v5 = vld [vmem:[%s447_s17] sm:$0xff]  ;;  %v481_v6 = vadd.f32 %v479_v3, %v477_v1  ;;  %v482_v7 = vadd.f32 %v480_v4, %v478_v2  ;;  %v485_v8 = vld [vmem:[%s447_s17 + $0x8] sm:$0xff]  ;;  %s701_s18 = sshll.u32 %s411_s16, 4  ;;  %s1265_s27 = scalar_lea.vmem %s1339_s8, %s943_s15  ;;  %s1267_s18 = int_to_ptr.vmem [resolvable:$true] %s701_s18 }
  0x1b   : > { %v486_v9 = vadd.f32 %v484_v5, %v477_v1  ;;  %v487_v10 = vadd.f32 %v485_v8, %v478_v2  ;;  %v489_v11 = vld [vmem:[%s455_s25] sm:$0xff]  ;;  %v490_v12 = vld [vmem:[%s455_s25 + $0x8] sm:$0xff]  ;;  %s1277_s17 = scalar_lea.sflag [#allocation3], %s409_s28  ;;  %s1036_s24 = scalar_lea.vmem %s1267_s18, 256 }
  0x1c   : > { %v483_v13 = vpack.c.bf16 %v482_v7, %v481_v6  ;;  %v491_v16 = vpack.c.bf16 %v490_v12, %v489_v11  ;;  %p1037_p12 = scmp.ne.s32.totalorder %s1267_s18, %s1036_s24  ;;  %s1116_s29 = smov [#allocation2]  }
  0x1d   : > { %v488_v15 = vpack.c.bf16 %v487_v10, %v486_v9  ;;  %s1040_s20 = sshll.u32 %s1116_s29, 4  ;;  %s1041_s20 = int_to_ptr.vmem [resolvable:$false] %s1040_s20 }
  0x1e   : > { %957 = vmatpush3.bf16.msra.mxu0 %v483_v13  ;;  %p1038_p13 = pnand %p1037_p12, %p1209_p4  ;;  %s1042_s25 = scalar_lea.vmem %s1041_s20, 512 }
  0x1f   : > { %963 = vmatpush3.bf16.msra.mxu1 %v488_v15  ;;  %968 = vmatprep.subr.bf16.mxu0 %v1114_v0  ;;  %p1043_p1 = scmp.lt.s32.totalorder %s1267_s18, %s1041_s20  ;;  %p1044_p2 = scmp.lt.s32.totalorder %s1042_s25, %s1036_s24 }
  0x20   : > { %p1039_p0 = pneg %p1038_p13 }
  0x21   : > { %959 = vmatmul.mubr.msk.bf16.vlgmr.msra.gmra.mxu0 %vm499_vm1, %v1033_v14  ;;  %p1045_p3 = por %p1044_p2, %p1043_p1 }
  0x22   : > { %969 = vmatpush3.bf16.msra.mxu0 %v491_v16  ;;  %965 = vmatmul.mubr.msk.bf16.vlgmr.msra.gmra.mxu1 %vm499_vm1, %v1034_v17 }
  0x23   : > { %970 = vmatprep.mubr.msk.bf16.mxu0 %vm1115_vm0, %v1114_v0  ;;  %p1046_p5 = pnand %p1045_p3, %p1039_p0 }
  0x29   : > { %971 = vmatmul.mubr.msk.bf16.vlgmr.msra.gmra.mxu0 %vm499_vm1, %v1035_v18 }
  0xe1   : > { %v537_v19 = vpop.f32.mrf.mxu0 }
  0xe2   : > { %545 = vst.msk [vmem:[%s411_s16] sm:$0xff] %vm544_vm2, %v537_v19  ;;  %v591_v20 = vpop.f32.mrf.mxu1 }
  0xe3   : > { %v960_v21 = vpop.f32.mrf.mxu0  ;;  %v945_v22 = vpack.c.bf16 %v591_v20, %v591_v20 }
  0xe4   : > { %v966_v23 = vpop.f32.mrf.mxu1 }
  0xe5   : > { %607 = vst.msk [vmem:[%s1265_s27] sm:$0xf] %vm606_vm3, %v945_v22  ;;  %v540_v24 = vpop.f32.mrf.mxu0 }
  0xe6   : > { %546 = vst.msk [vmem:[%s411_s16 + $0x8] sm:$0xff] %vm544_vm2, %v540_v24  ;;  %v594_v25 = vpop.f32.mrf.mxu1 }
  0xe7   : > { %v961_v26 = vpop.f32.mrf.mxu0  ;;  %v946_v27 = vpack.c.bf16 %v594_v25, %v594_v25 }
  0xe8   : > { %1049 = shalt.err (!%p1046_p5)
}
  0xe9   : > { %s1050_s28 = scalar_lea.hbm %s1272_s22, 256  ;;  %s1054_s12 = scalar_lea.hbm %s1338_s7, 512 }
  0xea   : > { %p1051_p6 = scmp.ne.s32.totalorder %s1272_s22, %s1050_s28  ;;  %p1055_p10 = scmp.lt.s32.totalorder %s1272_s22, %s1338_s7 }
  0xeb   : > { %p1056_p11 = scmp.lt.s32.totalorder %s1054_s12, %s1050_s28 }
  0xec   : > { %p1052_p7 = pnand %p1051_p6, %p1209_p4 }
  0xed   : > { %p1057_p12 = por %p1056_p11, %p1055_p10 }
  0xee   : > { %p1053_p9 = pneg %p1052_p7 }
  0xf0   : > { %p1058_p13 = pnand %p1057_p12, %p1053_p9 }
  0xf2   : > { %1061 = shalt.err (!%p1058_p13)
}
  0xf3   : > { %s1117_s24 = smov 128   ;;  %s1118_s20 = smov 8   ;;  %v967_v28 = vpop.f32.mrf.mxu1  ;;  %608 = vst.msk [vmem:[%s1265_s27 + $0x4] sm:$0xf] %vm606_vm3, %v946_v27  ;;  %v653_v29 = vpop.f32.mrf.mxu0 }
  0xf4   : > { %974 = dma.vmem_to_hbm [thread:$0]  (%p1209_p4), %s1267_s18, 256, %s1272_s22, %s1277_s17, %s1117_s24, %s1117_s24, %s1118_s20   ;;  %v947_v30 = vpack.c.bf16 %v653_v29, %v653_v29 }
  0xf5   : > { %s475_s28 = scalar_lea.vmem %s1340_s9, %s943_s15  ;;  %v972_v31 = vpop.f32.mrf.mxu0 }
  0xf6   : > { %668 = vst.msk [vmem:[%s475_s28] sm:$0xf] %vm606_vm3, %v947_v30 }
  0xf7   : > { %v656_v32 = vpop.f32.mrf.mxu0 }
  0xf8   : > { %v948_v33 = vpack.c.bf16 %v656_v32, %v656_v32 }
  0xf9   : > { %v973_v34 = vpop.f32.mrf.mxu0 }
  0xfa   : > { %669 = vst.msk [vmem:[%s475_s28 + $0x4] sm:$0xf] %vm606_vm3, %v948_v33 }
  0xfb PF: > { %p980_p4 = scmp.ge.s32.totalorder %s1112_s14, 2  ;;  %s722_s19 = sand.u32 1, %s1092_s30  }
  0xfc   : > { %s723_s23 = scalar_lea.sflag [#allocation3], %s722_s19 }
  0xfd   : > { %p977_p0 = pnand %p980_p4, %p1216_p8 }
  0xff   : > { %p978_p1 = pneg %p977_p0 }
 0x101   : > { %1087 = dma.done.wait (%p978_p1), %s723_s23, 256  }
 0x102   : > { %1089 = vsyncadd (%p978_p1), %s723_s23, 4294967040  ;;  %s23_s14 = sadd.s32 1, %s1112_s14   ;;  %s1348_s15 = sld [smem:[#allocation7_spill]] }
 0x103   : > { %p20_p2 = scmp.ge.s32.totalorder %s23_s14, 4   ;;  %s1349_s12 = sld [smem:[#allocation5_spill]] }
 0x104   : > { %s1350_s13 = sld [smem:[#allocation6_spill]]  ;;  %s1351_s30 = smov %s1096_s10 }
 0x105   : > { %s1352_s10 = smov %s1100_s11  ;;  %22 = sbr.rel (!%p20_p2) target bundleno = 4 (0x4), region = 116 }
 0x108   : > { %s1353_s11 = smov %s1348_s15 }
 0x10a   :  { %750 = vsyncpa [#allocation3], 1 }
 0x10b   :  { %752 = vsyncpa [#allocation3 + $0x1], 1 }

// kernel: transformer_unit_forward.4
= control target key start
LH: loop header
LB: loop body
LE: loop exit
PB: predicated region body
PF: predicated region fallthrough
CT: control target
= control target key end

     0   :  { %s2566_s13 = smov 0   ;;  %s2568_s14 = smov 0   ;;  %s3324_s0 = inlined_call_operand.vmem [shape: f32[2,16,64], index: 0, kind: input, shape index: {}]   ;;  %s3325_s1 = inlined_call_operand.vmem [shape: bf16[2,16,25,64], index: 1, kind: input, shape index: {}]   ;;  %s3326_s2 = inlined_call_operand.vmem [shape: bf16[2,16,25,64], index: 2, kind: input, shape index: {}]   ;;  %s3327_s3 = inlined_call_operand.vmem [shape: bf16[16,16], index: 3, kind: input, shape index: {}]   ;;  %s3328_s4 = inlined_call_operand.vmem [shape: bf16[32,16], index: 4, kind: input, shape index: {}]   ;;  %s3329_s5 = inlined_call_operand.vmem [shape: f32[32,1], index: 5, kind: input, shape index: {}]   ;;  %s3330_s6 = inlined_call_operand.vmem [shape: bf16[16,32], index: 6, kind: input, shape index: {}]   ;;  %s3331_s7 = inlined_call_operand.vmem [shape: f32[16,1], index: 7, kind: input, shape index: {}]   ;;  %s3332_s8 = inlined_call_operand.vmem [shape: bf16[2,16,64], index: 8, kind: output, shape index: {0}]   ;;  %s3333_s9 = inlined_call_operand.vmem [shape: f32[2,1,16,1], index: 9, kind: output, shape index: {1}]   ;;  %s3334_s10 = inlined_call_operand.vmem [shape: f32[2,1,16,1], index: 10, kind: output, shape index: {2}]  }
   0x1   :  { %s2570_s15 = smov 0  }
   0x2 LB: > { %s33_s16 = sadd.s32 1, %s2501_s14  ;;  %p2094_p0 = scmp.ge.s32.totalorder %s2505_s15, 1  ;;  %s2505_s15 = sphi %s2570_s15, %s21_s15   ;;  %s2501_s14 = sphi %s2568_s14, %s3352_s14   ;;  %s2497_s13 = sphi %s2566_s13, %s3351_s13  }
   0x3   : > { %p35_p1 = scmp.ge.s32.totalorder %s33_s16, 2  ;;  %p370_p2 = scmp.lt.s32.totalorder %s2505_s15, 3 }
   0x5   : > { %s3354_s16 = smov (%p35_p1, %s33_s16), 0  ;;  %p371_p3 = pnand %p2094_p0, %p370_p2 }
   0x6   : > { %p448_p4 = scmp.lt.s32.totalorder (!%p371_p3), %s2497_s13, 1 }
   0x7   : > { %374 = sbr.rel (%p371_p3) target bundleno = 995 (0x3e3), region = 52 }
   0xc   : > { %v538_v0 = vlaneseq  ;;  %v3335_v1 = vmov 0.0   ;;  %v2508_v2 = vmov 1966171168   ;;  %s3356_s13 = smov (!%p448_p4, %s2497_s13), 1  ;;  %vm595_vm0 = vcmask 523264  }
   0xd   : > { %2389 = vmatprep.subr.bf16.mxu0 %v3335_v1  ;;  %v536_v3 = vunpack.c.l.s4 %v2508_v2  ;;  %s2588_s17 = sshll.u32 %s3356_s13, 4  ;;  %s2216_s18 = sshll.u32 %s3356_s13, 8  ;;  %vm617_vm1 = vcmask 516096   ;;  %vm2509_vm2 = vmmov 0   ;;  %vm1571_vm3 = vcmask 1041409  }
   0xe   : > { %v539_v4 = vshrl.u32 %v538_v0, 7  ;;  %s2595_s21 = scalar_lea.vmem %s3324_s0, %s2588_s17  ;;  %s2602_s24 = scalar_lea.vmem %s3325_s1, %s2216_s18  ;;  %2391 = vmatprep.mubr.msk.bf16.mxu0 %vm2509_vm2, %v3335_v1  ;;  %vm1573_vm4 = vcmask 1042434   ;;  %vm1575_vm5 = vcmask 1043459   ;;  %vm1582_vm6 = vcmask 1045509  }
   0xf   : > { %v537_v5 = vunpack.c.0.s8 %v536_v3  ;;  %v499_v6 = vld [vmem:[%s2595_s21] sm:$0xff]  ;;  %v2351_v10 = vld [vmem:[%s2602_s24 + $0x10] sm:$0xff]   ;;  %v504_v11 = vld [vmem:[%s2602_s24 + $0x8] ss:$16 sps:$4 sm:$0xff]   ;;  %s2837_s27 = scalar_lea.vmem %s3326_s2, %s2216_s18  ;;  %vm1584_vm7 = vcmask 1046534   ;;  %vm1586_vm8 = vcmask 1047559   ;;  %s488_s23 = scalar_lea.vmem %s3333_s9, %s2588_s17 }
  0x10   : > { %v2607_v8 = vmul.f32 0.5, %v499_v6  ;;  %v2224_v9 = vld [vmem:[%s2602_s24] sm:$0xff]   ;;  %v505_v12 = vld [vmem:[%s2602_s24 + $0xc] sm:$0x1]  ;;  %v2616_v15 = vsub.s32 0, %v539_v4  ;;  %v2229_v18 = vunpack.c.l.bf16 %v2351_v10  ;;  %v2230_v20 = vunpack.c.h.bf16 %v2351_v10  ;;  %v2353_v23 = vld [vmem:[%s2602_s24 + $0x30] sm:$0xff]   ;;  %s497_s26 = scalar_lea.vmem %s3334_s10, %s2588_s17 }
  0x11   : > { %v2605_v7 = vsub.s32 %v537_v5, %v539_v4  ;;  %v2352_v13 = vld [vmem:[%s2602_s24 + $0x20] sm:$0xff]   ;;  %v2225_v16 = vunpack.c.l.bf16 %v2224_v9  ;;  %v2226_v17 = vunpack.c.h.bf16 %v2224_v9  ;;  %v509_v19 = vld [vmem:[%s2602_s24 + $0x1c] sm:$0x1]  ;;  %v512_v21 = vld [vmem:[%s2602_s24 + $0x28] ss:$16 sps:$4 sm:$0xff]   ;;  %v520_v24 = vunpack.c.l.bf16 %v504_v11  ;;  %s2218_s18 = sshll.u32 %s3356_s13, 3 }
  0x12   : > { %v513_v22 = vld [vmem:[%s2602_s24 + $0x2c] sm:$0x1]  ;;  %v2233_v27 = vunpack.c.l.bf16 %v2352_v13  ;;  %v2234_v28 = vunpack.c.h.bf16 %v2352_v13  ;;  %v521_v29 = vunpack.c.l.bf16 %v505_v12  ;;  %v524_v30 = vunpack.c.h.bf16 %v504_v11  ;;  %v517_v31 = vld [vmem:[%s2602_s24 + $0x3c] sm:$0x1] }
  0x13   : > { %v541_v14 = vrot.slane %v2607_v8, %v2605_v7  ;;  %v525_v32 = vunpack.c.l.bf16 %v509_v19  ;;  %v2237_v36 = vunpack.c.l.bf16 %v2353_v23  ;;  %v2238_v37 = vunpack.c.h.bf16 %v2353_v23 }
  0x14   : > { %v528_v38 = vunpack.c.l.bf16 %v512_v21  ;;  %v529_v39 = vunpack.c.l.bf16 %v513_v22  ;;  %v532_v40 = vunpack.c.h.bf16 %v512_v21  ;;  %v533_v44 = vunpack.c.l.bf16 %v517_v31 }
  0x15   : > { %v542_v25 = vcombine.high %v541_v14, %v541_v14  ;;  %v549_v26 = vrot.slane %v541_v14, %v2605_v7  ;;  %vm1605_vm9 = vcmask 1043456   ;;  %vm1616_vm10 = vcmask 130048  }
  0x16   : > { %vm1788_vm15 = vcmask 261120  }
  0x17   : > { %v556_v33 = vrot.slane %v542_v25, %v2605_v7  ;;  %v557_v34 = vcombine.high %v549_v26, %v549_v26  ;;  %v562_v35 = vrot.slane %v549_v26, %v2616_v15 }
  0x19   : > { %v558_v41 = vcombine.high %v556_v33, %v556_v33  ;;  %v566_v42 = vrot.slane %v556_v33, %v2616_v15  ;;  %v570_v43 = vrot.slane %v557_v34, %v2616_v15  ;;  %v579_v45 = vmul.f32 %v2225_v16, %v562_v35 }
  0x1a   : > { %v580_v46 = vmul.f32 %v2226_v17, %v562_v35  ;;  %v581_v47 = vmul.f32 %v562_v35, %v520_v24  ;;  %v582_v49 = vmul.f32 %v562_v35, %v521_v29 }
  0x1b   : > { %v574_v48 = vrot.slane %v558_v41, %v2616_v15  ;;  %v583_v50 = vmul.f32 %v2229_v18, %v566_v42  ;;  %v584_v51 = vmul.f32 %v2230_v20, %v566_v42  ;;  %v585_v52 = vmul.f32 %v566_v42, %v524_v30 }
  0x1c   : > { %v586_v53 = vmul.f32 %v566_v42, %v525_v32  ;;  %v587_v54 = vmul.f32 %v2233_v27, %v570_v43  ;;  %v588_v55 = vmul.f32 %v2234_v28, %v570_v43  ;;  %v589_v56 = vmul.f32 %v570_v43, %v528_v38  ;;  %v2357_v38 = vld [vmem:[%s2602_s24 + $0x40] sm:$0xff]  }
  0x1d   : > { %v590_v57 = vmul.f32 %v570_v43, %v529_v39  ;;  %v591_v58 = vmul.f32 %v2237_v36, %v574_v48  ;;  %v592_v59 = vmul.f32 %v2238_v37, %v574_v48  ;;  %v593_v60 = vmul.f32 %v574_v48, %v532_v40  ;;  %v2358_v39 = vld [vmem:[%s2602_s24 + $0x50] sm:$0xff]   ;;  %v2359_v42 = vld [vmem:[%s2602_s24 + $0x60] sm:$0xff]  }
  0x1e   : > { %v596_v61 = vsel %vm595_vm0, %v579_v45, 0.0  ;;  %v597_v62 = vsel %vm595_vm0, %v583_v50, 0.0  ;;  %v599_v63 = vsel %vm595_vm0, %v587_v54, 0.0  ;;  %v594_v0 = vmul.f32 %v574_v48, %v533_v44 }
  0x1f   : > { %v598_v2 = vadd.f32 %v597_v62, %v596_v61  ;;  %v603_v3 = vsel %vm595_vm0, %v580_v46, 0.0  ;;  %v604_v4 = vsel %vm595_vm0, %v584_v51, 0.0  ;;  %v601_v5 = vsel %vm595_vm0, %v591_v58, 0.0 }
  0x20   : > { %v605_v6 = vadd.f32 %v604_v4, %v603_v3  ;;  %v606_v9 = vsel %vm595_vm0, %v588_v55, 0.0  ;;  %v610_v10 = vsel %vm595_vm0, %v581_v47, 0.0  ;;  %v608_v12 = vsel %vm595_vm0, %v592_v59, 0.0  ;;  %v2360_v47 = vld [vmem:[%s2602_s24 + $0x70] sm:$0xff]  }
  0x21   : > { %v600_v11 = vadd.f32 %v599_v63, %v598_v2  ;;  %v611_v13 = vsel %vm595_vm0, %v585_v52, 0.0  ;;  %v613_v14 = vsel %vm595_vm0, %v589_v56, 0.0  ;;  %v618_v18 = vsel %vm617_vm1, %v582_v49, 0.0  ;;  %v2109_v49 = vld [vmem:[%s2602_s24 + $0x48] ss:$16 sps:$4 sm:$0xff]  }
  0x22   : > { %v607_v16 = vadd.f32 %v606_v9, %v605_v6  ;;  %v612_v17 = vadd.f32 %v611_v13, %v610_v10  ;;  %v619_v19 = vsel %vm617_vm1, %v586_v53, 0.0  ;;  %v615_v21 = vsel %vm595_vm0, %v593_v60, 0.0  ;;  %v2110_v53 = vld [vmem:[%s2602_s24 + $0x4c] sm:$0x1]  ;;  %v2117_v63 = vld [vmem:[%s2602_s24 + $0x68] ss:$16 sps:$4 sm:$0xff]  }
  0x23   : > { %v2642_v20 = vadd.f32 %v601_v5, %v600_v11  ;;  %v620_v22 = vadd.f32 %v619_v19, %v618_v18  ;;  %v621_v23 = vsel %vm617_vm1, %v590_v57, 0.0  ;;  %v623_v26 = vsel %vm617_vm1, %v594_v0, 0.0  ;;  %v2114_v57 = vld [vmem:[%s2602_s24 + $0x5c] sm:$0x1]  ;;  %v2118_v0 = vld [vmem:[%s2602_s24 + $0x6c] sm:$0x1] }
  0x24   : > { %v2646_v24 = vadd.f32 %v608_v12, %v607_v16  ;;  %v614_v25 = vadd.f32 %v613_v14, %v612_v17  ;;  %v801_v36 = vcombine.high %v2607_v8, %v2607_v8  ;;  %v2257_v45 = vunpack.c.l.bf16 %v2357_v38  ;;  %v2122_v5 = vld [vmem:[%s2602_s24 + $0x7c] sm:$0x1] }
  0x25   : > { %v622_v27 = vadd.f32 %v621_v23, %v620_v22  ;;  %v625_v28 = vsel %vm595_vm0, %v2642_v20, -inf  ;;  %v2261_v46 = vunpack.c.l.bf16 %v2358_v39  ;;  %v2258_v52 = vunpack.c.h.bf16 %v2357_v38 }
  0x26   : > { %v2651_v29 = vadd.f32 %v615_v21, %v614_v25  ;;  %v626_v30 = vsel %vm595_vm0, %v2646_v24, -inf  ;;  %v808_v40 = vrot.slane %v801_v36, %v2605_v7  ;;  %v2262_v54 = vunpack.c.h.bf16 %v2358_v39 }
  0x27   : > { %v2655_v31 = vadd.f32 %v623_v26, %v622_v27  ;;  %v629_v33 = vmax.f32 %v625_v28, %v626_v30  ;;  %v2265_v55 = vunpack.c.l.bf16 %v2359_v42  ;;  %v2266_v56 = vunpack.c.h.bf16 %v2359_v42 }
  0x28   : > { %v627_v32 = vsel %vm595_vm0, %v2651_v29, -inf  ;;  %v809_v43 = vcombine.high %v808_v40, %v808_v40  ;;  %v816_v44 = vrot.slane %v808_v40, %v2605_v7  ;;  %v2269_v58 = vunpack.c.l.bf16 %v2360_v47 }
  0x29   : > { %v628_v34 = vsel %vm617_vm1, %v2655_v31, -inf  ;;  %v2270_v2 = vunpack.c.h.bf16 %v2360_v47  ;;  %v787_v3 = vunpack.c.l.bf16 %v2109_v49  ;;  %v788_v6 = vunpack.c.l.bf16 %v2110_v53 }
  0x2a   : > { %v630_v35 = vmax.f32 %v627_v32, %v628_v34  ;;  %v823_v8 = vrot.slane %v809_v43, %v2605_v7  ;;  %v824_v50 = vcombine.high %v816_v44, %v816_v44  ;;  %v829_v51 = vrot.slane %v816_v44, %v2616_v15 }
  0x2b   : > { %v791_v9 = vunpack.c.h.bf16 %v2109_v49  ;;  %v792_v12 = vunpack.c.l.bf16 %v2114_v57  ;;  %v795_v17 = vunpack.c.l.bf16 %v2117_v63  ;;  %v796_v18 = vunpack.c.l.bf16 %v2118_v0  ;;  %v500_v57 = vld [vmem:[%s2595_s21 + $0x8] sm:$0xff]  ;;  %s479_s21 = scalar_lea.vmem %s3332_s8, %s2218_s18 }
  0x2c   : > { %v631_v37 = vmax.f32 %v629_v33, %v630_v35  ;;  %v825_v59 = vcombine.high %v823_v8, %v823_v8  ;;  %v833_v60 = vrot.slane %v823_v8, %v2616_v15  ;;  %v837_v61 = vrot.slane %v824_v50, %v2616_v15 }
  0x2d   : > { %v846_v4 = vmul.f32 %v2257_v45, %v829_v51  ;;  %v847_v13 = vmul.f32 %v2258_v52, %v829_v51  ;;  %v799_v19 = vunpack.c.h.bf16 %v2117_v63  ;;  %v800_v23 = vunpack.c.l.bf16 %v2122_v5 }
  0x2e   : > { %v632_v41 = vrot.slane %v631_v37, 4  ;;  %v841_v10 = vrot.slane %v825_v59, %v2616_v15  ;;  %v850_v11 = vmul.f32 %v2261_v46, %v833_v60  ;;  %v851_v14 = vmul.f32 %v2262_v54, %v833_v60 }
  0x2f   : > { %v854_v16 = vmul.f32 %v2265_v55, %v837_v61  ;;  %v855_v21 = vmul.f32 %v2266_v56, %v837_v61  ;;  %v848_v25 = vmul.f32 %v829_v51, %v787_v3  ;;  %v862_v26 = vsel %vm595_vm0, %v846_v4, 0.0 }
  0x30   : > { %v633_v48 = vmax.f32 %v631_v37, %v632_v41  ;;  %v852_v27 = vmul.f32 %v833_v60, %v791_v9  ;;  %v858_v28 = vmul.f32 %v2269_v58, %v841_v10  ;;  %v863_v30 = vsel %vm595_vm0, %v850_v11, 0.0 }
  0x31   : > { %v865_v32 = vsel %vm595_vm0, %v854_v16, 0.0  ;;  %v859_v33 = vmul.f32 %v2270_v2, %v841_v10  ;;  %v864_v34 = vadd.f32 %v863_v30, %v862_v26  ;;  %v869_v35 = vsel %vm595_vm0, %v847_v13, 0.0 }
  0x32   : > { %v634_v62 = vrot.slane %v633_v48, 2  ;;  %v870_v36 = vsel %vm595_vm0, %v851_v14, 0.0  ;;  %v849_v37 = vmul.f32 %v829_v51, %v788_v6  ;;  %v853_v38 = vmul.f32 %v833_v60, %v792_v12 }
  0x33   : > { %v856_v39 = vmul.f32 %v837_v61, %v795_v17  ;;  %v872_v40 = vsel %vm595_vm0, %v855_v21, 0.0  ;;  %v860_v41 = vmul.f32 %v841_v10, %v799_v19  ;;  %v866_v42 = vadd.f32 %v865_v32, %v864_v34 }
  0x34   : > { %v635_v22 = vmax.f32 %v633_v48, %v634_v62  ;;  %v871_v43 = vadd.f32 %v870_v36, %v869_v35  ;;  %v876_v44 = vsel %vm595_vm0, %v848_v25, 0.0  ;;  %v857_v46 = vmul.f32 %v837_v61, %v796_v18  ;;  %v2365_v18 = vld [vmem:[%s2602_s24 + $0x80] sm:$0xff]   ;;  %v2368_v35 = vld [vmem:[%s2602_s24 + $0xb0] sm:$0xff]  }
  0x35   : > { %v867_v47 = vsel %vm595_vm0, %v858_v28, 0.0  ;;  %v861_v48 = vmul.f32 %v841_v10, %v800_v23  ;;  %v874_v8 = vsel %vm595_vm0, %v859_v33, 0.0  ;;  %v877_v50 = vsel %vm595_vm0, %v852_v27, 0.0  ;;  %v2366_v23 = vld [vmem:[%s2602_s24 + $0x90] sm:$0xff]   ;;  %v2367_v25 = vld [vmem:[%s2602_s24 + $0xa0] sm:$0xff]  }
  0x36   : > { %v636_v45 = vrot.slane %v635_v22, 1  ;;  %v873_v49 = vadd.f32 %v872_v40, %v871_v43  ;;  %v878_v51 = vadd.f32 %v877_v50, %v876_v44  ;;  %v879_v52 = vsel %vm595_vm0, %v856_v39, 0.0 }
  0x37   : > { %v2691_v53 = vadd.f32 %v867_v47, %v866_v42  ;;  %v881_v54 = vsel %vm595_vm0, %v860_v41, 0.0  ;;  %v883_v55 = vsel %vm617_vm1, %v849_v37, 0.0  ;;  %v884_v56 = vsel %vm617_vm1, %v853_v38, 0.0  ;;  %v2142_v42 = vld [vmem:[%s2602_s24 + $0x8c] sm:$0x1] }
  0x38   : > { %v2697_v58 = vadd.f32 %v874_v8, %v873_v49  ;;  %v880_v59 = vadd.f32 %v879_v52, %v878_v51  ;;  %v885_v60 = vadd.f32 %v884_v56, %v883_v55  ;;  %v886_v61 = vsel %vm617_vm1, %v857_v46, 0.0  ;;  %v2149_v46 = vld [vmem:[%s2602_s24 + $0xa8] ss:$16 sps:$4 sm:$0xff]   ;;  %v2150_v49 = vld [vmem:[%s2602_s24 + $0xac] sm:$0x1] }
  0x39   : > { %v637_v62 = vmax.f32 %v635_v22, %v636_v45  ;;  %v888_v63 = vsel %vm617_vm1, %v861_v48, 0.0  ;;  %v2703_v3 = vmul.f32 0.5, %v500_v57  ;;  %v890_v5 = vsel %vm595_vm0, %v2691_v53, -inf  ;;  %v2146_v45 = vld [vmem:[%s2602_s24 + $0x9c] sm:$0x1] }
  0x3a   : > { %v2701_v0 = vadd.f32 %v881_v54, %v880_v59  ;;  %v887_v2 = vadd.f32 %v886_v61, %v885_v60  ;;  %v891_v6 = vsel %vm595_vm0, %v2697_v58, -inf  ;;  %v2289_v30 = vunpack.c.l.bf16 %v2365_v18 }
  0x3b   : > { %v638_v10 = vsub.f32 %v2642_v20, %v637_v62  ;;  %v639_v11 = vsub.f32 %v2646_v24, %v637_v62  ;;  %v1075_v13 = vrot.slane %v2703_v3, %v2605_v7  ;;  %v640_v14 = vsub.f32 %v2651_v29, %v637_v62 }
  0x3c   : > { %v2705_v4 = vadd.f32 %v888_v63, %v887_v2  ;;  %v892_v9 = vsel %vm595_vm0, %v2701_v0, -inf  ;;  %v894_v16 = vmax.f32 %v890_v5, %v891_v6  ;;  %v641_v20 = vsub.f32 %v2655_v31, %v637_v62  ;;  %v2141_v31 = vld [vmem:[%s2602_s24 + $0x88] ss:$16 sps:$4 sm:$0xff]   ;;  %v2154_v2 = vld [vmem:[%s2602_s24 + $0xbc] sm:$0x1] }
  0x3d   : > { %v1076_v19 = vcombine.high %v1075_v13, %v1075_v13  ;;  %v1083_v21 = vrot.slane %v1075_v13, %v2605_v7  ;;  %v642_v22 = vmul.f32 1.442695, %v638_v10  ;;  %v644_v24 = vmul.f32 1.442695, %v639_v11 }
  0x3e   : > { %v893_v12 = vsel %vm617_vm1, %v2705_v4, -inf  ;;  %v646_v28 = vmul.f32 1.442695, %v640_v14  ;;  %v2290_v33 = vunpack.c.h.bf16 %v2365_v18  ;;  %v2293_v34 = vunpack.c.l.bf16 %v2366_v23 }
  0x3f   : > { %v895_v17 = vmax.f32 %v892_v9, %v893_v12  ;;  %v1090_v26 = vrot.slane %v1076_v19, %v2605_v7  ;;  %v1091_v27 = vcombine.high %v1083_v21, %v1083_v21  ;;  %v1096_v32 = vrot.slane %v1083_v21, %v2616_v15 }
  0x40   : > { %2443 = vpow2.f32 %v642_v22  ;;  %v2294_v38 = vunpack.c.h.bf16 %v2366_v23  ;;  %v2297_v39 = vunpack.c.l.bf16 %v2367_v25  ;;  %v648_v41 = vmul.f32 1.442695, %v641_v20 }
  0x41   : > { %v896_v29 = vmax.f32 %v894_v16, %v895_v17  ;;  %v1092_v36 = vcombine.high %v1090_v26, %v1090_v26  ;;  %v1100_v37 = vrot.slane %v1090_v26, %v2616_v15  ;;  %v1104_v40 = vrot.slane %v1091_v27, %v2616_v15 }
  0x42   : > { %2445 = vpow2.f32 %v644_v24  ;;  %v2298_v43 = vunpack.c.h.bf16 %v2367_v25  ;;  %v2301_v47 = vunpack.c.l.bf16 %v2368_v35  ;;  %v1113_v48 = vmul.f32 %v2289_v30, %v1096_v32 }
  0x43   : > { %2447 = vpow2.f32 %v646_v28  ;;  %v897_v44 = vrot.slane %v896_v29, 4  ;;  %v2302_v8 = vunpack.c.h.bf16 %v2368_v35  ;;  %v1054_v50 = vunpack.c.l.bf16 %v2141_v31 }
  0x44   : > { %v1108_v51 = vrot.slane %v1092_v36, %v2616_v15  ;;  %v1117_v52 = vmul.f32 %v2293_v34, %v1100_v37  ;;  %v1055_v54 = vunpack.c.l.bf16 %v2142_v42  ;;  %v1114_v55 = vmul.f32 %v2290_v33, %v1096_v32 }
  0x45   : > { %v1118_v56 = vmul.f32 %v2294_v38, %v1100_v37  ;;  %v1121_v57 = vmul.f32 %v2297_v39, %v1104_v40  ;;  %v1058_v59 = vunpack.c.h.bf16 %v2141_v31  ;;  %v1059_v60 = vunpack.c.l.bf16 %v2146_v45 }
  0x46   : > { %v1062_v61 = vunpack.c.l.bf16 %v2149_v46  ;;  %v1122_v62 = vmul.f32 %v2298_v43, %v1104_v40  ;;  %v898_v63 = vmax.f32 %v896_v29, %v897_v44  ;;  %v1063_v5 = vunpack.c.l.bf16 %v2150_v49 }
  0x47   : > { %v1066_v6 = vunpack.c.h.bf16 %v2149_v46  ;;  %v1129_v9 = vsel %vm595_vm0, %v1113_v48, 0.0  ;;  %v1115_v10 = vmul.f32 %v1096_v32, %v1054_v50  ;;  %v1125_v11 = vmul.f32 %v2301_v47, %v1108_v51 }
  0x48   : > { %v1126_v12 = vmul.f32 %v2302_v8, %v1108_v51  ;;  %v1130_v13 = vsel %vm595_vm0, %v1117_v52, 0.0  ;;  %v1132_v16 = vsel %vm595_vm0, %v1121_v57, 0.0  ;;  %v1136_v17 = vsel %vm595_vm0, %v1114_v55, 0.0 }
  0x49   : > { %v1131_v14 = vadd.f32 %v1130_v13, %v1129_v9  ;;  %v1137_v18 = vsel %vm595_vm0, %v1118_v56, 0.0  ;;  %2449 = vpow2.f32 %v648_v41  ;;  %v1067_v19 = vunpack.c.l.bf16 %v2154_v2 }
  0x4a   : > { %v1138_v21 = vadd.f32 %v1137_v18, %v1136_v17  ;;  %v1139_v22 = vsel %vm595_vm0, %v1122_v62, 0.0  ;;  %v899_v23 = vrot.slane %v898_v63, 2  ;;  %v1116_v20 = vmul.f32 %v1096_v32, %v1055_v54 }
  0x4b   : > { %v1119_v24 = vmul.f32 %v1100_v37, %v1058_v59  ;;  %v1123_v25 = vmul.f32 %v1104_v40, %v1062_v61  ;;  %v1120_v26 = vmul.f32 %v1100_v37, %v1059_v60  ;;  %v1124_v27 = vmul.f32 %v1104_v40, %v1063_v5 }
  0x4c   : > { %v1133_v28 = vadd.f32 %v1132_v16, %v1131_v14  ;;  %v1140_v29 = vadd.f32 %v1139_v22, %v1138_v21  ;;  %v1127_v30 = vmul.f32 %v1108_v51, %v1066_v6  ;;  %v1134_v33 = vsel %vm595_vm0, %v1125_v11, 0.0 }
  0x4d   : > { %v1141_v34 = vsel %vm595_vm0, %v1126_v12, 0.0  ;;  %v1143_v35 = vsel %vm595_vm0, %v1115_v10, 0.0  ;;  %v2746_v36 = vpop.eup %2443  ;;  %v900_v38 = vmax.f32 %v898_v63, %v899_v23  ;;  %v1128_v39 = vmul.f32 %v1108_v51, %v1067_v19 }
  0x4e   : > { %v1144_v32 = vsel %vm595_vm0, %v1119_v24, 0.0  ;;  %v1146_v37 = vsel %vm595_vm0, %v1123_v25, 0.0  ;;  %v1135_v41 = vadd.f32 %v1134_v33, %v1133_v28  ;;  %v2754_v42 = vadd.f32 %v1141_v34, %v1140_v29 }
  0x4f   : > { %v2748_v31 = vpop.eup %2445  ;;  %v1145_v43 = vadd.f32 %v1144_v32, %v1143_v35  ;;  %v1150_v44 = vsel %vm617_vm1, %v1116_v20, 0.0  ;;  %v1148_v45 = vsel %vm595_vm0, %v1127_v30, 0.0  ;;  %v1151_v46 = vsel %vm617_vm1, %v1120_v26, 0.0 }
  0x50   : > { %v2752_v40 = vpop.eup %2447  ;;  %v1153_v47 = vsel %vm617_vm1, %v1124_v27, 0.0  ;;  %v1152_v49 = vadd.f32 %v1151_v46, %v1150_v44  ;;  %v650_v8 = vsel %vm595_vm0, %v2746_v36, 0.0  ;;  %v651_v50 = vsel %vm595_vm0, %v2748_v31, 0.0  ;;  %v2373_v44 = vld [vmem:[%s2602_s24 + $0xc0] sm:$0xff]  }
  0x51   : > { %v1147_v48 = vadd.f32 %v1146_v37, %v1145_v43  ;;  %v901_v51 = vrot.slane %v900_v38, 1  ;;  %v1155_v52 = vsel %vm617_vm1, %v1128_v39, 0.0  ;;  %v1157_v56 = vsel %vm595_vm0, %v1135_v41, -inf }
  0x52   : > { %v1154_v55 = vadd.f32 %v1153_v47, %v1152_v49  ;;  %v1158_v57 = vsel %vm595_vm0, %v2754_v42, -inf  ;;  %v652_v59 = vadd.f32 %v651_v50, %v650_v8  ;;  %v653_v63 = vsel %vm595_vm0, %v2752_v40, 0.0 }
  0x53   : > { %v2765_v54 = vadd.f32 %v1148_v45, %v1147_v48  ;;  %v902_v2 = vmax.f32 %v900_v38, %v901_v51  ;;  %v1161_v5 = vmax.f32 %v1157_v56, %v1158_v57  ;;  %v2374_v45 = vld [vmem:[%s2602_s24 + $0xd0] sm:$0xff]   ;;  %v2321_v50 = vunpack.c.l.bf16 %v2373_v44  ;;  %v2173_v57 = vld [vmem:[%s2602_s24 + $0xc8] ss:$16 sps:$4 sm:$0xff]  }
  0x54   : > { %v2770_v60 = vadd.f32 %v1155_v52, %v1154_v55  ;;  %v654_v10 = vadd.f32 %v653_v63, %v652_v59  ;;  %v2325_v51 = vunpack.c.l.bf16 %v2374_v45  ;;  %v2375_v52 = vld [vmem:[%s2602_s24 + $0xe0] sm:$0xff]   ;;  %v2174_v59 = vld [vmem:[%s2602_s24 + $0xcc] sm:$0x1] }
  0x55   : > { %v1159_v61 = vsel %vm595_vm0, %v2765_v54, -inf  ;;  %v903_v12 = vsub.f32 %v2691_v53, %v902_v2  ;;  %v904_v14 = vsub.f32 %v2697_v58, %v902_v2  ;;  %v905_v19 = vsub.f32 %v2701_v0, %v902_v2 }
  0x56   : > { %v2774_v62 = vpop.eup %2449  ;;  %v1160_v6 = vsel %vm617_vm1, %v2770_v60, -inf  ;;  %v906_v20 = vsub.f32 %v2705_v4, %v902_v2  ;;  %v1334_v58 = vcombine.high %v2703_v3, %v2703_v3 }
  0x57   : > { %v1162_v9 = vmax.f32 %v1159_v61, %v1160_v6  ;;  %v655_v11 = vsel %vm617_vm1, %v2774_v62, 0.0  ;;  %v907_v18 = vmul.f32 1.442695, %v903_v12  ;;  %v909_v21 = vmul.f32 1.442695, %v904_v14 }
  0x58   : > { %v656_v16 = vadd.f32 %v655_v11, %v654_v10  ;;  %v911_v24 = vmul.f32 1.442695, %v905_v19  ;;  %v913_v53 = vmul.f32 1.442695, %v906_v20  ;;  %v1341_v0 = vrot.slane %v1334_v58, %v2605_v7  ;;  %v2376_v11 = vld [vmem:[%s2602_s24 + $0xf0] sm:$0xff]  }
  0x59   : > { %v1163_v13 = vmax.f32 %v1161_v5, %v1162_v9  ;;  %2451 = vpow2.f32 %v907_v18  ;;  %v2322_v6 = vunpack.c.h.bf16 %v2373_v44  ;;  %v2326_v9 = vunpack.c.h.bf16 %v2374_v45  ;;  %v2181_v19 = vld [vmem:[%s2602_s24 + $0xe8] ss:$16 sps:$4 sm:$0xff]  }
  0x5a   : > { %v657_v22 = vrot.slane %v656_v16, 4  ;;  %2453 = vpow2.f32 %v909_v21  ;;  %v1342_v35 = vcombine.high %v1341_v0, %v1341_v0  ;;  %v1349_v46 = vrot.slane %v1341_v0, %v2605_v7 }
  0x5b   : > { %v1164_v17 = vrot.slane %v1163_v13, 4  ;;  %2455 = vpow2.f32 %v911_v24  ;;  %v2330_v10 = vunpack.c.h.bf16 %v2375_v52  ;;  %v1320_v12 = vunpack.c.l.bf16 %v2173_v57 }
  0x5c   : > { %v658_v25 = vadd.f32 %v657_v22, %v656_v16  ;;  %2457 = vpow2.f32 %v913_v53  ;;  %v1357_v61 = vcombine.high %v1349_v46, %v1349_v46  ;;  %v1362_v2 = vrot.slane %v1349_v46, %v2616_v15  ;;  %v2182_v22 = vld [vmem:[%s2602_s24 + $0xec] sm:$0x1] }
  0x5d   : > { %v1165_v23 = vmax.f32 %v1163_v13, %v1164_v17  ;;  %v1321_v13 = vunpack.c.l.bf16 %v2174_v59  ;;  %v1324_v14 = vunpack.c.h.bf16 %v2173_v57 }
  0x5e   : > { %v659_v27 = vrot.slane %v658_v25, 2  ;;  %v1379_v20 = vmul.f32 %v2321_v50, %v1362_v2  ;;  %v1380_v53 = vmul.f32 %v2322_v6, %v1362_v2  ;;  %v1381_v0 = vmul.f32 %v1362_v2, %v1320_v12 }
  0x5f   : > { %v1166_v26 = vrot.slane %v1165_v23, 2 }
  0x60   : > { %v660_v29 = vadd.f32 %v659_v27, %v658_v25  ;;  %v2333_v25 = vunpack.c.l.bf16 %v2376_v11  ;;  %v2334_v27 = vunpack.c.h.bf16 %v2376_v11  ;;  %v1402_v45 = vsel %vm595_vm0, %v1380_v53, 0.0 }
  0x61   : > { %v1167_v28 = vmax.f32 %v1165_v23, %v1166_v26  ;;  %v1370_v23 = vrot.slane %v1357_v61, %v2616_v15 }
  0x62   : > { %v661_v38 = vrot.slane %v660_v29, 1 }
  0x63   : > { %v1168_v30 = vrot.slane %v1167_v28, 1  ;;  %v1388_v44 = vmul.f32 %v2330_v10, %v1370_v23  ;;  %v2240_v10 = vld [vmem:[%s2837_s27] sm:$0xff]  }
  0x64   : > { %v662_v49 = vadd.f32 %v661_v38, %v660_v29  ;;  %v2186_v38 = vld [vmem:[%s2602_s24 + $0xfc] sm:$0x1] }
  0x65   : > { %v1169_v4 = vmax.f32 %v1167_v28, %v1168_v30  ;;  %v1328_v28 = vunpack.c.l.bf16 %v2181_v19  ;;  %v1333_v50 = vunpack.c.l.bf16 %v2186_v38 }
  0x66   : > { %v2789_v33 = vpop.eup %2451 }
  0x67   : > { %v2791_v34 = vpop.eup %2453  ;;  %v1170_v39 = vsub.f32 %v1135_v41, %v1169_v4  ;;  %v1171_v3 = vsub.f32 %v2754_v42, %v1169_v4  ;;  %v915_v32 = vsel %vm595_vm0, %v2789_v33, 0.0  ;;  %v1172_v41 = vsub.f32 %v2765_v54, %v1169_v4 }
  0x68   : > { %v916_v37 = vsel %vm595_vm0, %v2791_v34, 0.0  ;;  %v2801_v47 = vpop.eup %2455  ;;  %v1356_v42 = vrot.slane %v1342_v35, %v2605_v7  ;;  %v1173_v56 = vsub.f32 %v2770_v60, %v1169_v4  ;;  %v2178_v7 = vld [vmem:[%s2602_s24 + $0xdc] sm:$0x1]  ;;  %v2329_v60 = vunpack.c.l.bf16 %v2375_v52 }
  0x69   : > { %v1174_v43 = vmul.f32 1.442695, %v1170_v39  ;;  %v1176_v48 = vmul.f32 1.442695, %v1171_v3  ;;  %v917_v8 = vadd.f32 %v916_v37, %v915_v32  ;;  %v918_v55 = vsel %vm595_vm0, %v2801_v47, 0.0  ;;  %v2811_v54 = vpop.eup %2457 }
  0x6a   : > { %v1178_v63 = vmul.f32 1.442695, %v1172_v41  ;;  %v1366_v5 = vrot.slane %v1356_v42, %v2616_v15  ;;  %v920_v17 = vsel %vm617_vm1, %v2811_v54, 0.0  ;;  %v1180_v18 = vmul.f32 1.442695, %v1173_v56 }
  0x6b   : > { %2459 = vpow2.f32 %v1174_v43  ;;  %v919_v16 = vadd.f32 %v918_v55, %v917_v8  ;;  %v1325_v21 = vunpack.c.l.bf16 %v2178_v7  ;;  %v1358_v26 = vcombine.high %v1356_v42, %v1356_v42 }
  0x6c   : > { %2461 = vpow2.f32 %v1176_v48  ;;  %v1383_v24 = vmul.f32 %v2325_v51, %v1366_v5  ;;  %v1384_v58 = vmul.f32 %v2326_v9, %v1366_v5  ;;  %v1385_v29 = vmul.f32 %v1366_v5, %v1324_v14  ;;  %v2850_v14 = vld [vmem:[%s2837_s27 + $0x10] sm:$0xff]  }
  0x6d   : > { %2463 = vrcp.f32 %v662_v49  ;;  %v921_v30 = vadd.f32 %v920_v17, %v919_v16  ;;  %v1329_v4 = vunpack.c.l.bf16 %v2182_v22  ;;  %v1382_v35 = vmul.f32 %v1362_v2, %v1321_v13 }
  0x6e   : > { %2465 = vpow2.f32 %v1178_v63  ;;  %v1386_v39 = vmul.f32 %v1366_v5, %v1325_v21  ;;  %v1387_v3 = vmul.f32 %v2329_v60, %v1370_v23  ;;  %v1395_v32 = vsel %vm595_vm0, %v1379_v20, 0.0 }
  0x6f   : > { %2467 = vpow2.f32 %v1180_v18  ;;  %v1396_v37 = vsel %vm595_vm0, %v1383_v24, 0.0  ;;  %v1374_v43 = vrot.slane %v1358_v26, %v2616_v15  ;;  %v1403_v46 = vsel %vm595_vm0, %v1384_v58, 0.0  ;;  %v2355_v26 = vld [vmem:[%s2837_s27 + $0x20] sm:$0xff]  }
  0x70   : > { %v1332_v41 = vunpack.c.h.bf16 %v2181_v19  ;;  %v1389_v48 = vmul.f32 %v1370_v23, %v1328_v28  ;;  %v1409_v42 = vsel %vm595_vm0, %v1381_v0, 0.0  ;;  %v1410_v49 = vsel %vm595_vm0, %v1385_v29, 0.0  ;;  %v2356_v28 = vld [vmem:[%s2837_s27 + $0x30] sm:$0xff]  }
  0x71   : > { %v922_v8 = vrot.slane %v921_v30, 4  ;;  %v1390_v51 = vmul.f32 %v1370_v23, %v1329_v4  ;;  %v1397_v52 = vadd.f32 %v1396_v37, %v1395_v32  ;;  %v1398_v15 = vsel %vm595_vm0, %v1387_v3, 0.0  ;;  %v671_v32 = vld [vmem:[%s2837_s27 + $0xc] sm:$0x1] }
  0x72   : > { %v1404_v56 = vadd.f32 %v1403_v46, %v1402_v45  ;;  %v1416_v57 = vsel %vm617_vm1, %v1382_v35, 0.0  ;;  %v1417_v59 = vsel %vm617_vm1, %v1386_v39, 0.0  ;;  %v1391_v63 = vmul.f32 %v2333_v25, %v1374_v43 }
  0x73   : > { %v1392_v7 = vmul.f32 %v2334_v27, %v1374_v43  ;;  %v1405_v2 = vsel %vm595_vm0, %v1388_v44, 0.0  ;;  %v1411_v5 = vadd.f32 %v1410_v49, %v1409_v42  ;;  %v1393_v9 = vmul.f32 %v1374_v43, %v1332_v41 }
  0x74   : > { %v1412_v60 = vsel %vm595_vm0, %v1389_v48, 0.0  ;;  %v1394_v11 = vmul.f32 %v1374_v43, %v1333_v50  ;;  %v1399_v12 = vadd.f32 %v1398_v15, %v1397_v52  ;;  %v1418_v13 = vadd.f32 %v1417_v59, %v1416_v57  ;;  %v678_v50 = vld [vmem:[%s2837_s27 + $0x28] ss:$16 sps:$4 sm:$0xff]  }
  0x75   : > { %v1406_v18 = vadd.f32 %v1405_v2, %v1404_v56  ;;  %v1419_v19 = vsel %vm617_vm1, %v1390_v51, 0.0  ;;  %v923_v22 = vadd.f32 %v922_v8, %v921_v30  ;;  %v1400_v23 = vsel %vm595_vm0, %v1391_v63, 0.0  ;;  %v670_v30 = vld [vmem:[%s2837_s27 + $0x8] ss:$16 sps:$4 sm:$0xff]   ;;  %v2884_v8 = vld [vmem:[%s2837_s27 + $0x1c] sm:$0x1] }
  0x76   : > { %v1407_v20 = vsel %vm595_vm0, %v1392_v7, 0.0  ;;  %v1413_v24 = vadd.f32 %v1412_v60, %v1411_v5  ;;  %v2241_v25 = vunpack.c.l.bf16 %v2240_v10  ;;  %v1414_v53 = vsel %vm595_vm0, %v1393_v9, 0.0  ;;  %v2888_v51 = vld [vmem:[%s2837_s27 + $0x2c] sm:$0x1]  ;;  %v2901_v7 = vld [vmem:[%s2837_s27 + $0x3c] sm:$0x1] }
  0x77   : > { %v2242_v58 = vunpack.c.h.bf16 %v2240_v10  ;;  %v2245_v27 = vunpack.c.l.bf16 %v2850_v14  ;;  %v1420_v29 = vadd.f32 %v1419_v19, %v1418_v13  ;;  %v2870_v38 = vadd.f32 %v1400_v23, %v1399_v12  ;;  %v2908_v13 = vld [vmem:[%s2837_s27 + $0x40] sm:$0xff]  }
  0x78   : > { %v2830_v55 = vpop.eup %2459  ;;  %v2872_v39 = vadd.f32 %v1407_v20, %v1406_v18  ;;  %v1421_v3 = vsel %vm617_vm1, %v1394_v11, 0.0  ;;  %v2246_v37 = vunpack.c.h.bf16 %v2850_v14  ;;  %v2249_v43 = vunpack.c.l.bf16 %v2355_v26 }
  0x79   : > { %v2842_v61 = vpop.eup %2461  ;;  %v1182_v16 = vsel %vm595_vm0, %v2830_v55, 0.0  ;;  %v924_v44 = vrot.slane %v923_v22, 2  ;;  %v2877_v45 = vadd.f32 %v1414_v53, %v1413_v24  ;;  %v2250_v41 = vunpack.c.h.bf16 %v2355_v26 }
  0x7a   : > { %v2845_v6 = vpop.eup %2463  ;;  %v1183_v17 = vsel %vm595_vm0, %v2842_v61, 0.0  ;;  %v2253_v48 = vunpack.c.l.bf16 %v2356_v28  ;;  %v2254_v42 = vunpack.c.h.bf16 %v2356_v28  ;;  %v686_v52 = vunpack.c.l.bf16 %v670_v30 }
  0x7b   : > { %v2857_v21 = vpop.eup %2465  ;;  %v1184_v0 = vadd.f32 %v1183_v17, %v1182_v16  ;;  %v664_v46 = vmul.f32 %v2845_v6, %v2746_v36  ;;  %v665_v49 = vmul.f32 %v2845_v6, %v2748_v31  ;;  %v2890_v56 = vadd.f32 %v1421_v3, %v1420_v29 }
  0x7c   : > { %v2865_v4 = vpop.eup %2467  ;;  %v1185_v35 = vsel %vm595_vm0, %v2857_v21, 0.0  ;;  %v687_v57 = vunpack.c.l.bf16 %v671_v32  ;;  %v1423_v59 = vsel %vm595_vm0, %v2870_v38, -inf  ;;  %v1424_v31 = vsel %vm595_vm0, %v2872_v39, -inf }
  0x7d   : > { %v1186_v15 = vadd.f32 %v1185_v35, %v1184_v0  ;;  %v1187_v36 = vsel %vm617_vm1, %v2865_v4, 0.0  ;;  %v666_v63 = vmul.f32 %v2845_v6, %v2752_v40  ;;  %v690_v2 = vunpack.c.h.bf16 %v670_v30 }
  0x7e   : > { %v925_v5 = vadd.f32 %v924_v44, %v923_v22  ;;  %v1425_v9 = vsel %vm595_vm0, %v2877_v45, -inf  ;;  %v691_v60 = vunpack.c.l.bf16 %v2884_v8  ;;  %v694_v10 = vunpack.c.l.bf16 %v678_v50 }
  0x7f   : > { %v695_v11 = vunpack.c.l.bf16 %v2888_v51  ;;  %v700_v12 = vmul.f32 %v2241_v25, %v664_v46  ;;  %v701_v14 = vmul.f32 %v2242_v58, %v665_v49  ;;  %v1188_v16 = vadd.f32 %v1187_v36, %v1186_v15 }
  0x80   : > { %v1426_v40 = vsel %vm617_vm1, %v2890_v56, -inf  ;;  %v1427_v17 = vmax.f32 %v1423_v59, %v1424_v31  ;;  %v667_v18 = vmul.f32 %v2845_v6, %v2774_v62  ;;  %v698_v19 = vunpack.c.h.bf16 %v678_v50 }
  0x81   : > { %v699_v22 = vunpack.c.l.bf16 %v2901_v7  ;;  %v1428_v23 = vmax.f32 %v1425_v9, %v1426_v40  ;;  %v702_v20 = vmul.f32 %v686_v52, %v666_v63  ;;  %v926_v24 = vrot.slane %v925_v5, 1 }
  0x82   : > { %v2273_v26 = vunpack.c.l.bf16 %v2908_v13  ;;  %v1189_v25 = vrot.slane %v1188_v16, 4  ;;  %v704_v53 = vmul.f32 %v2245_v27, %v664_v46  ;;  %v705_v28 = vmul.f32 %v2246_v37, %v665_v49 }
  0x83   : > { %v708_v58 = vmul.f32 %v2249_v43, %v664_v46  ;;  %v1429_v0 = vmax.f32 %v1427_v17, %v1428_v23  ;;  %v709_v29 = vmul.f32 %v2250_v41, %v665_v49  ;;  %v716_v30 = vsel %vm595_vm0, %v700_v12, 0.0  ;;  %v2920_v43 = vld [vmem:[%s2837_s27 + $0x50] sm:$0xff]   ;;  %v2933_v12 = vld [vmem:[%s2837_s27 + $0x60] sm:$0xff]  }
  0x84   : > { %v717_v35 = vsel %vm595_vm0, %v701_v14, 0.0  ;;  %v1190_v62 = vadd.f32 %v1189_v25, %v1188_v16  ;;  %v703_v6 = vmul.f32 %v687_v57, %v667_v18  ;;  %v712_v3 = vmul.f32 %v2253_v48, %v664_v46  ;;  %v2937_v23 = vld [vmem:[%s2837_s27 + $0x70] sm:$0xff]  }
  0x85   : > { %v713_v32 = vmul.f32 %v2254_v42, %v665_v49  ;;  %v1430_v44 = vrot.slane %v1429_v0, 4  ;;  %v706_v8 = vmul.f32 %v690_v2, %v666_v63  ;;  %v710_v50 = vmul.f32 %v694_v10, %v666_v63 }
  0x86   : > { %v927_v51 = vadd.f32 %v926_v24, %v925_v5  ;;  %v1191_v52 = vrot.slane %v1190_v62, 2  ;;  %v714_v15 = vmul.f32 %v698_v19, %v666_v63  ;;  %v718_v27 = vadd.f32 %v717_v35, %v716_v30 }
  0x87   : > { %v719_v37 = vsel %vm595_vm0, %v702_v20, 0.0  ;;  %v1431_v41 = vmax.f32 %v1429_v0, %v1430_v44  ;;  %v729_v36 = vsel %vm595_vm0, %v704_v53, 0.0  ;;  %v730_v59 = vsel %vm595_vm0, %v705_v28, 0.0  ;;  %v2946_v44 = vld [vmem:[%s2837_s27 + $0x48] ss:$16 sps:$4 sm:$0xff]  }
  0x88   : > { %v742_v46 = vsel %vm595_vm0, %v708_v58, 0.0  ;;  %v743_v48 = vsel %vm595_vm0, %v709_v29, 0.0  ;;  %v755_v42 = vsel %vm595_vm0, %v712_v3, 0.0  ;;  %v756_v49 = vsel %vm595_vm0, %v713_v32, 0.0 }
  0x89   : > { %v1192_v57 = vadd.f32 %v1191_v52, %v1190_v62  ;;  %v1432_v31 = vrot.slane %v1431_v41, 2  ;;  %2469 = vrcp.f32 %v927_v51  ;;  %v2274_v63 = vunpack.c.h.bf16 %v2908_v13 }
  0x8a   : > { %v2277_v7 = vunpack.c.l.bf16 %v2920_v43  ;;  %v2278_v2 = vunpack.c.h.bf16 %v2920_v43  ;;  %v707_v5 = vmul.f32 %v691_v60, %v667_v18  ;;  %v721_v9 = vsel %vm617_vm1, %v703_v6, 0.0 }
  0x8b   : > { %v731_v10 = vadd.f32 %v730_v59, %v729_v36  ;;  %v1433_v14 = vmax.f32 %v1431_v41, %v1432_v31  ;;  %v720_v16 = vadd.f32 %v719_v37, %v718_v27  ;;  %v732_v40 = vsel %vm595_vm0, %v706_v8, 0.0  ;;  %v2949_v8 = vld [vmem:[%s2837_s27 + $0x4c] sm:$0x1]  ;;  %v2962_v27 = vld [vmem:[%s2837_s27 + $0x68] ss:$16 sps:$4 sm:$0xff]  }
  0x8c   : > { %v744_v17 = vadd.f32 %v743_v48, %v742_v46  ;;  %v757_v19 = vadd.f32 %v756_v49, %v755_v42  ;;  %v745_v20 = vsel %vm595_vm0, %v710_v50, 0.0  ;;  %v758_v24 = vsel %vm595_vm0, %v714_v15, 0.0  ;;  %v2967_v41 = vld [vmem:[%s2837_s27 + $0x6c] sm:$0x1]  ;;  %v2972_v48 = vld [vmem:[%s2837_s27 + $0x7c] sm:$0x1] }
  0x8d   : > { %v1193_v60 = vrot.slane %v1192_v57, 1  ;;  %v1434_v25 = vrot.slane %v1433_v14, 1  ;;  %v711_v53 = vmul.f32 %v695_v11, %v667_v18  ;;  %v715_v28 = vmul.f32 %v699_v22, %v667_v18  ;;  %v2952_v11 = vld [vmem:[%s2837_s27 + $0x5c] sm:$0x1] }
  0x8e   : > { %v2281_v58 = vunpack.c.l.bf16 %v2933_v12  ;;  %v2282_v0 = vunpack.c.h.bf16 %v2933_v12  ;;  %v733_v29 = vadd.f32 %v732_v40, %v731_v10  ;;  %v734_v30 = vsel %vm617_vm1, %v707_v5, 0.0  ;;  %v2980_v10 = vld [vmem:[%s2837_s27 + $0x90] sm:$0xff]  }
  0x8f   : > { %v2285_v35 = vunpack.c.l.bf16 %v2937_v23  ;;  %v1435_v62 = vmax.f32 %v1433_v14, %v1434_v25  ;;  %v722_v6 = vadd.f32 %v721_v9, %v720_v16  ;;  %v746_v3 = vadd.f32 %v745_v20, %v744_v17 }
  0x90   : > { %v759_v32 = vadd.f32 %v758_v24, %v757_v19  ;;  %v1194_v18 = vadd.f32 %v1193_v60, %v1192_v57  ;;  %v747_v52 = vsel %vm617_vm1, %v711_v53, 0.0  ;;  %v760_v15 = vsel %vm617_vm1, %v715_v28, 0.0  ;;  %v2977_v57 = vld [vmem:[%s2837_s27 + $0x80] sm:$0xff]   ;;  %v2992_v28 = vld [vmem:[%s2837_s27 + $0x88] ss:$16 sps:$4 sm:$0xff]  }
  0x91   : > { %v1436_v22 = vsub.f32 %v2870_v38, %v1435_v62  ;;  %v1437_v50 = vsub.f32 %v2872_v39, %v1435_v62  ;;  %v1438_v51 = vsub.f32 %v2877_v45, %v1435_v62  ;;  %v2286_v37 = vunpack.c.h.bf16 %v2937_v23  ;;  %v2988_v60 = vld [vmem:[%s2837_s27 + $0xa0] sm:$0xff]  }
  0x92   : > { %v1439_v38 = vsub.f32 %v2890_v56, %v1435_v62  ;;  %v952_v39 = vunpack.c.l.bf16 %v2946_v44  ;;  %v953_v45 = vunpack.c.l.bf16 %v2949_v8  ;;  %v735_v46 = vadd.f32 %v734_v30, %v733_v29  ;;  %v2996_v30 = vld [vmem:[%s2837_s27 + $0xb0] sm:$0xff]  }
  0x93   : > { %v1440_v36 = vmul.f32 1.442695, %v1436_v22  ;;  %v1442_v59 = vmul.f32 1.442695, %v1437_v50  ;;  %v956_v42 = vunpack.c.h.bf16 %v2946_v44  ;;  %v957_v49 = vunpack.c.l.bf16 %v2952_v11  ;;  %v3003_v50 = vld [vmem:[%s2837_s27 + $0x9c] sm:$0x1] }
  0x94   : > { %v1444_v56 = vmul.f32 1.442695, %v1438_v51  ;;  %v723_v31 = vrot.slane %v722_v6, 4  ;;  %v748_v5 = vadd.f32 %v747_v52, %v746_v3  ;;  %v761_v9 = vadd.f32 %v760_v15, %v759_v32  ;;  %v3027_v15 = vld [vmem:[%s2837_s27 + $0xc0] sm:$0xff]  }
  0x95   : > { %2471 = vrcp.f32 %v1194_v18  ;;  %v960_v14 = vunpack.c.l.bf16 %v2962_v27  ;;  %v961_v16 = vunpack.c.l.bf16 %v2967_v41  ;;  %v1446_v40 = vmul.f32 1.442695, %v1439_v38  ;;  %v2999_v18 = vld [vmem:[%s2837_s27 + $0x8c] sm:$0x1] }
  0x96   : > { %2473 = vpow2.f32 %v1440_v36  ;;  %v2470_v17 = vpop.eup %2469  ;;  %v964_v19 = vunpack.c.h.bf16 %v2962_v27  ;;  %v965_v20 = vunpack.c.l.bf16 %v2972_v48  ;;  %v2305_v24 = vunpack.c.l.bf16 %v2977_v57  ;;  %v3013_v36 = vld [vmem:[%s2837_s27 + $0xac] sm:$0x1] }
  0x97   : > { %2475 = vpow2.f32 %v1442_v59  ;;  %v736_v25 = vrot.slane %v735_v46, 4  ;;  %v2306_v53 = vunpack.c.h.bf16 %v2977_v57  ;;  %v724_v62 = vadd.f32 %v723_v31, %v722_v6  ;;  %v3010_v6 = vld [vmem:[%s2837_s27 + $0xa8] ss:$16 sps:$4 sm:$0xff]  }
  0x98   : > { %2477 = vpow2.f32 %v1444_v56  ;;  %v749_v3 = vrot.slane %v748_v5, 4  ;;  %v762_v32 = vrot.slane %v761_v9, 4  ;;  %v929_v51 = vmul.f32 %v2470_v17, %v2789_v33  ;;  %v3021_v33 = vld [vmem:[%s2837_s27 + $0xbc] sm:$0x1] }
  0x99   : > { %v930_v52 = vmul.f32 %v2470_v17, %v2791_v34  ;;  %2479 = vpow2.f32 %v1446_v40  ;;  %v3018_v1 = vadd.f32 %v736_v25, %v735_v46  ;;  %v725_v22 = vrot.slane %v724_v62, 2 }
  0x9a   : > { %v3029_v29 = vadd.f32 %v749_v3, %v748_v5  ;;  %v3031_v59 = vadd.f32 %v762_v32, %v761_v9  ;;  %v931_v56 = vmul.f32 %v2470_v17, %v2801_v47  ;;  %v966_v46 = vmul.f32 %v2273_v26, %v929_v51 }
  0x9b   : > { %v967_v25 = vmul.f32 %v2274_v63, %v930_v52  ;;  %v1227_v34 = vunpack.c.l.bf16 %v3010_v6  ;;  %v1228_v40 = vunpack.c.l.bf16 %v3013_v36  ;;  %v932_v38 = vmul.f32 %v2470_v17, %v2811_v54 }
  0x9c   : > { %v1231_v31 = vunpack.c.h.bf16 %v3010_v6  ;;  %v738_v47 = vrot.slane %v3018_v1, 2  ;;  %v970_v26 = vmul.f32 %v2277_v7, %v929_v51  ;;  %v971_v13 = vmul.f32 %v2278_v2, %v930_v52 }
  0x9d   : > { %v3050_v3 = vadd.f32 %v725_v22, %v724_v62  ;;  %v751_v54 = vrot.slane %v3029_v29, 2  ;;  %v764_v17 = vrot.slane %v3031_v59, 2  ;;  %v968_v32 = vmul.f32 %v952_v39, %v931_v56 }
  0x9e   : > { %v974_v5 = vmul.f32 %v2281_v58, %v929_v51  ;;  %v975_v7 = vmul.f32 %v2282_v0, %v930_v52  ;;  %v982_v43 = vsel %vm595_vm0, %v966_v46, 0.0  ;;  %v983_v2 = vsel %vm595_vm0, %v967_v25, 0.0 }
  0x9f   : > { %v969_v22 = vmul.f32 %v953_v45, %v932_v38  ;;  %v972_v63 = vmul.f32 %v956_v42, %v931_v56  ;;  %v973_v39 = vmul.f32 %v957_v49, %v932_v38  ;;  %v976_v58 = vmul.f32 %v960_v14, %v931_v56 }
  0xa0   : > { %v977_v0 = vmul.f32 %v961_v16, %v932_v38  ;;  %v978_v46 = vmul.f32 %v2285_v35, %v929_v51  ;;  %v995_v8 = vsel %vm595_vm0, %v970_v26, 0.0  ;;  %v996_v45 = vsel %vm595_vm0, %v971_v13, 0.0 }
  0xa1   : > { %v979_v11 = vmul.f32 %v2286_v37, %v930_v52  ;;  %v980_v42 = vmul.f32 %v964_v19, %v931_v56  ;;  %v981_v49 = vmul.f32 %v965_v20, %v932_v38  ;;  %v984_v41 = vadd.f32 %v983_v2, %v982_v43 }
  0xa2   : > { %v2472_v9 = vpop.eup %2471  ;;  %v985_v14 = vsel %vm595_vm0, %v968_v32, 0.0  ;;  %v1008_v35 = vsel %vm595_vm0, %v974_v5, 0.0  ;;  %v1009_v16 = vsel %vm595_vm0, %v975_v7, 0.0  ;;  %v987_v23 = vsel %vm617_vm1, %v969_v22, 0.0 }
  0xa3   : > { %v3062_v62 = vpop.eup %2473  ;;  %v1196_v51 = vmul.f32 %v2472_v9, %v2830_v55  ;;  %v997_v37 = vadd.f32 %v996_v45, %v995_v8  ;;  %v998_v27 = vsel %vm595_vm0, %v972_v63, 0.0  ;;  %v1197_v19 = vmul.f32 %v2472_v9, %v2842_v61 }
  0xa4   : > { %v3072_v12 = vpop.eup %2475  ;;  %v1000_v48 = vsel %vm617_vm1, %v973_v39, 0.0  ;;  %v1448_v20 = vsel %vm595_vm0, %v3062_v62, 0.0  ;;  %v986_v38 = vadd.f32 %v985_v14, %v984_v41  ;;  %v1010_v56 = vadd.f32 %v1009_v16, %v1008_v35 }
  0xa5   : > { %v3080_v44 = vpop.eup %2477  ;;  %v1449_v52 = vsel %vm595_vm0, %v3072_v12, 0.0  ;;  %v1198_v5 = vmul.f32 %v2472_v9, %v2857_v21  ;;  %v1011_v13 = vsel %vm595_vm0, %v976_v58, 0.0  ;;  %v1013_v61 = vsel %vm617_vm1, %v977_v0, 0.0 }
  0xa6   : > { %v3092_v25 = vpop.eup %2479  ;;  %v1451_v55 = vsel %vm595_vm0, %v3080_v44, 0.0  ;;  %v1450_v26 = vadd.f32 %v1449_v52, %v1448_v20  ;;  %v1233_v63 = vmul.f32 %v2305_v24, %v1196_v51  ;;  %v1234_v7 = vmul.f32 %v2306_v53, %v1197_v19 }
  0xa7   : > { %v1453_v32 = vsel %vm617_vm1, %v3092_v25, 0.0  ;;  %v3337_v43 = vunpack.c.l.bf16 %v2980_v10  ;;  %v3338_v22 = vunpack.c.h.bf16 %v2980_v10  ;;  %v999_v8 = vadd.f32 %v998_v27, %v997_v37 }
  0xa8   : > { %v1452_v39 = vadd.f32 %v1451_v55, %v1450_v26  ;;  %v1021_v58 = vsel %vm595_vm0, %v978_v46, 0.0  ;;  %v1022_v0 = vsel %vm595_vm0, %v979_v11, 0.0  ;;  %v1199_v24 = vmul.f32 %v2472_v9, %v2865_v4 }
  0xa9   : > { %v1237_v2 = vmul.f32 %v3337_v43, %v1196_v51  ;;  %v1238_v21 = vmul.f32 %v3338_v22, %v1197_v19  ;;  %v988_v45 = vadd.f32 %v987_v23, %v986_v38  ;;  %v1024_v41 = vsel %vm595_vm0, %v980_v42, 0.0 }
  0xaa   : > { %v3339_v57 = vunpack.c.l.bf16 %v2992_v28  ;;  %v1454_v14 = vadd.f32 %v1453_v32, %v1452_v39  ;;  %v3340_v35 = vunpack.c.h.bf16 %v2992_v28  ;;  %v3341_v10 = vunpack.c.l.bf16 %v2988_v60 }
  0xab   : > { %v3342_v37 = vunpack.c.h.bf16 %v2988_v60  ;;  %v1249_v11 = vsel %vm595_vm0, %v1233_v63, 0.0  ;;  %v1250_v4 = vsel %vm595_vm0, %v1234_v7, 0.0  ;;  %v1262_v9 = vsel %vm595_vm0, %v1237_v2, 0.0 }
  0xac   : > { %v1235_v53 = vmul.f32 %v3339_v57, %v1198_v5  ;;  %v1239_v16 = vmul.f32 %v3340_v35, %v1198_v5  ;;  %v1241_v20 = vmul.f32 %v3341_v10, %v1196_v51  ;;  %v1263_v42 = vsel %vm595_vm0, %v1238_v21, 0.0 }
  0xad   : > { %v1242_v46 = vmul.f32 %v3342_v37, %v1197_v19  ;;  %v1455_v23 = vrot.slane %v1454_v14, 4  ;;  %v1012_v27 = vadd.f32 %v1011_v13, %v1010_v56  ;;  %v1023_v52 = vadd.f32 %v1022_v0, %v1021_v58 }
  0xae   : > { %v1026_v28 = vsel %vm617_vm1, %v981_v49, 0.0  ;;  %v3343_v55 = vunpack.c.l.bf16 %v2999_v18  ;;  %v3344_v26 = vunpack.c.l.bf16 %v3003_v50  ;;  %v1243_v63 = vmul.f32 %v1227_v34, %v1198_v5 }
  0xaf   : > { %v3345_v32 = vunpack.c.l.bf16 %v2996_v30  ;;  %v1456_v43 = vadd.f32 %v1455_v23, %v1454_v14  ;;  %v3346_v2 = vunpack.c.h.bf16 %v2996_v30  ;;  %v1251_v56 = vadd.f32 %v1250_v4, %v1249_v11  ;;  %v3167_v11 = vld [vmem:[%s2837_s27 + $0xd0] sm:$0xff]  }
  0xb0   : > { %v1236_v38 = vmul.f32 %v3343_v55, %v1199_v24  ;;  %v1240_v60 = vmul.f32 %v3344_v26, %v1199_v24  ;;  %v1252_v13 = vsel %vm595_vm0, %v1235_v53, 0.0  ;;  %v1264_v49 = vadd.f32 %v1263_v42, %v1262_v9 }
  0xb1   : > { %v1245_v7 = vmul.f32 %v3345_v32, %v1196_v51  ;;  %v1246_v22 = vmul.f32 %v3346_v2, %v1197_v19  ;;  %v1265_v18 = vsel %vm595_vm0, %v1239_v16, 0.0  ;;  %v1275_v21 = vsel %vm595_vm0, %v1241_v20, 0.0 }
  0xb2   : > { %v1276_v50 = vsel %vm595_vm0, %v1242_v46, 0.0  ;;  %v1457_v39 = vrot.slane %v1456_v43, 2  ;;  %v989_v58 = vrot.slane %v988_v45, 4  ;;  %v1001_v34 = vadd.f32 %v1000_v48, %v999_v8 }
  0xb3   : > { %v1014_v0 = vadd.f32 %v1013_v61, %v1012_v27  ;;  %v1025_v57 = vadd.f32 %v1024_v41, %v1023_v52  ;;  %v1244_v51 = vmul.f32 %v1228_v40, %v1199_v24  ;;  %v1247_v30 = vmul.f32 %v1231_v31, %v1198_v5  ;;  %v3175_v52 = vld [vmem:[%s2837_s27 + $0xe0] sm:$0xff]  }
  0xb4   : > { %v1254_v19 = vsel %vm617_vm1, %v1236_v38, 0.0  ;;  %v1458_v53 = vadd.f32 %v1457_v39, %v1456_v43  ;;  %v1253_v14 = vadd.f32 %v1252_v13, %v1251_v56  ;;  %v1266_v35 = vadd.f32 %v1265_v18, %v1264_v49  ;;  %v2189_v49 = vld [vmem:[%s2837_s27 + $0xc8] ss:$16 sps:$4 sm:$0xff]  }
  0xb5   : > { %v1267_v16 = vsel %vm617_vm1, %v1240_v60, 0.0  ;;  %v1277_v10 = vadd.f32 %v1276_v50, %v1275_v21  ;;  %v1278_v20 = vsel %vm595_vm0, %v1243_v63, 0.0  ;;  %v1288_v48 = vsel %vm595_vm0, %v1245_v7, 0.0  ;;  %v2380_v21 = vld [vmem:[%s2837_s27 + $0xf0] sm:$0xff]  }
  0xb6   : > { %v1289_v61 = vsel %vm595_vm0, %v1246_v22, 0.0  ;;  %v1459_v36 = vrot.slane %v1458_v53, 1  ;;  %v739_v6 = vadd.f32 %v738_v47, %v3018_v1  ;;  %v990_v31 = vadd.f32 %v989_v58, %v988_v45 }
  0xb7   : > { %v1002_v40 = vrot.slane %v1001_v34, 4  ;;  %v1027_v5 = vadd.f32 %v1026_v28, %v1025_v57  ;;  %v752_v8 = vadd.f32 %v751_v54, %v3029_v29  ;;  %v765_v41 = vadd.f32 %v764_v17, %v3031_v59 }
  0xb8   : > { %v1015_v37 = vrot.slane %v1014_v0, 4  ;;  %v1460_v46 = vadd.f32 %v1459_v36, %v1458_v53  ;;  %v1255_v4 = vadd.f32 %v1254_v19, %v1253_v14  ;;  %v1268_v9 = vadd.f32 %v1267_v16, %v1266_v35  ;;  %v2194_v53 = vld [vmem:[%s2837_s27 + $0xdc] sm:$0x1]  ;;  %v2197_v14 = vld [vmem:[%s2837_s27 + $0xe8] ss:$16 sps:$4 sm:$0xff]  }
  0xb9   : > { %v1279_v42 = vadd.f32 %v1278_v20, %v1277_v10  ;;  %v1290_v1 = vadd.f32 %v1289_v61, %v1288_v48  ;;  %v3347_v47 = vunpack.c.l.bf16 %v3021_v33  ;;  %v1280_v23 = vsel %vm617_vm1, %v1244_v51, 0.0  ;;  %v2198_v36 = vld [vmem:[%s2837_s27 + $0xec] sm:$0x1] }
  0xba   : > { %v1291_v29 = vsel %vm595_vm0, %v1247_v30, 0.0  ;;  %2481 = vrcp.f32 %v1460_v46  ;;  %v991_v54 = vrot.slane %v990_v31, 2  ;;  %v1003_v27 = vadd.f32 %v1002_v40, %v1001_v34 }
  0xbb   : > { %v1248_v45 = vmul.f32 %v3347_v47, %v1199_v24  ;;  %v1028_v59 = vrot.slane %v1027_v5, 4  ;;  %v2341_v17 = vunpack.c.l.bf16 %v3167_v11  ;;  %v727_v28 = vrot.slane %v3050_v3, 1 }
  0xbc   : > { %v740_v55 = vrot.slane %v739_v6, 1  ;;  %v753_v38 = vrot.slane %v752_v8, 1  ;;  %v766_v33 = vrot.slane %v765_v41, 1  ;;  %v1256_v24 = vrot.slane %v1255_v4, 4 }
  0xbd   : > { %v1269_v26 = vrot.slane %v1268_v9, 4  ;;  %v1281_v60 = vadd.f32 %v1280_v23, %v1279_v42  ;;  %v1292_v63 = vadd.f32 %v1291_v29, %v1290_v1  ;;  %v1016_v32 = vadd.f32 %v1015_v37, %v1014_v0  ;;  %v2190_v0 = vld [vmem:[%s2837_s27 + $0xcc] sm:$0x1] }
  0xbe   : > { %v1293_v7 = vsel %vm617_vm1, %v1248_v45, 0.0  ;;  %v2342_v43 = vunpack.c.h.bf16 %v3167_v11  ;;  %v2345_v2 = vunpack.c.l.bf16 %v3175_v52  ;;  %v992_v22 = vadd.f32 %v991_v54, %v990_v31 }
  0xbf   : > { %v1004_v56 = vrot.slane %v1003_v27, 2  ;;  %v1029_v13 = vadd.f32 %v1028_v59, %v1027_v5  ;;  %v2346_v18 = vunpack.c.h.bf16 %v3175_v52  ;;  %v728_v50 = vadd.f32 %v727_v28, %v3050_v3 }
  0xc0   : > { %v741_v39 = vadd.f32 %v740_v55, %v739_v6  ;;  %v3185_v58 = vadd.f32 %v753_v38, %v752_v8  ;;  %v3187_v34 = vadd.f32 %v766_v33, %v765_v41  ;;  %v1257_v57 = vadd.f32 %v1256_v24, %v1255_v4  ;;  %v2202_v6 = vld [vmem:[%s2837_s27 + $0xfc] sm:$0x1] }
  0xc1   : > { %v1270_v51 = vadd.f32 %v1269_v26, %v1268_v9  ;;  %v1282_v30 = vrot.slane %v1281_v60, 4  ;;  %v1294_v19 = vadd.f32 %v1293_v7, %v1292_v63  ;;  %v1017_v35 = vrot.slane %v1016_v32, 2 }
  0xc2   : > { %v2349_v16 = vunpack.c.l.bf16 %v2380_v21  ;;  %v2350_v10 = vunpack.c.h.bf16 %v2380_v21  ;;  %v1485_v20 = vunpack.c.l.bf16 %v2189_v49  ;;  %v993_v48 = vrot.slane %v992_v22, 1 }
  0xc3   : > { %v3192_v3 = vadd.f32 %v1004_v56, %v1003_v27  ;;  %v1030_v61 = vrot.slane %v1029_v13, 2  ;;  %v1486_v31 = vunpack.c.l.bf16 %v2190_v0  ;;  %v1489_v40 = vunpack.c.h.bf16 %v2189_v49 }
  0xc4   : > { %v1490_v5 = vunpack.c.l.bf16 %v2194_v53  ;;  %v1493_v8 = vunpack.c.l.bf16 %v2197_v14  ;;  %v1258_v41 = vrot.slane %v1257_v57, 2  ;;  %v1271_v37 = vrot.slane %v1270_v51, 2 }
  0xc5   : > { %v1283_v46 = vadd.f32 %v1282_v30, %v1281_v60  ;;  %v1295_v4 = vrot.slane %v1294_v19, 4  ;;  %v3196_v9 = vadd.f32 %v1017_v35, %v1016_v32  ;;  %v1494_v42 = vunpack.c.l.bf16 %v2198_v36 }
  0xc6   : > { %v1497_v1 = vunpack.c.h.bf16 %v2197_v14  ;;  %v1498_v47 = vunpack.c.l.bf16 %v2202_v6  ;;  %v3198_v23 = vadd.f32 %v993_v48, %v992_v22  ;;  %v1006_v29 = vrot.slane %v3192_v3, 1 }
  0xc7   : > { %v2482_v45 = vpop.eup %2481  ;;  %v3201_v54 = vadd.f32 %v1030_v61, %v1029_v13  ;;  %v3204_v27 = vsel %vm1571_vm3, %v741_v39, %v728_v50  ;;  %v3210_v38 = vadd.f32 %v1258_v41, %v1257_v57  ;;  %v3212_v33 = vadd.f32 %v1271_v37, %v1270_v51 }
  0xc8   : > { %v1462_v59 = vmul.f32 %v2482_v45, %v3062_v62  ;;  %v1463_v52 = vmul.f32 %v2482_v45, %v3072_v12  ;;  %v1464_v28 = vmul.f32 %v2482_v45, %v3080_v44  ;;  %v1465_v55 = vmul.f32 %v2482_v45, %v3092_v25 }
  0xc9   : > { %v1284_v24 = vrot.slane %v1283_v46, 2  ;;  %v1296_v26 = vadd.f32 %v1295_v4, %v1294_v19  ;;  %v3348_v60 = vunpack.c.l.bf16 %v3027_v15  ;;  %v3349_v32 = vunpack.c.h.bf16 %v3027_v15 }
  0xca   : > { %v1501_v22 = vmul.f32 %v1485_v20, %v1464_v28  ;;  %v1502_v62 = vmul.f32 %v1486_v31, %v1465_v55  ;;  %v1503_v12 = vmul.f32 %v2341_v17, %v1462_v59  ;;  %v1504_v44 = vmul.f32 %v2342_v43, %v1463_v52 }
  0xcb   : > { %v1499_v63 = vmul.f32 %v3348_v60, %v1462_v59  ;;  %v1500_v7 = vmul.f32 %v3349_v32, %v1463_v52  ;;  %v1505_v56 = vmul.f32 %v1489_v40, %v1464_v28  ;;  %v1506_v25 = vmul.f32 %v1490_v5, %v1465_v55 }
  0xcc   : > { %v1507_v13 = vmul.f32 %v2345_v2, %v1462_v59  ;;  %v1508_v49 = vmul.f32 %v2346_v18, %v1463_v52  ;;  %v1509_v21 = vmul.f32 %v1493_v8, %v1464_v28  ;;  %v1510_v50 = vmul.f32 %v1494_v42, %v1465_v55 }
  0xcd   : > { %v1511_v39 = vmul.f32 %v2349_v16, %v1462_v59  ;;  %v1512_v0 = vmul.f32 %v2350_v10, %v1463_v52  ;;  %v1513_v57 = vmul.f32 %v1497_v1, %v1464_v28  ;;  %v1514_v51 = vmul.f32 %v1498_v47, %v1465_v55 }
  0xce   : > { %v1515_v30 = vsel %vm595_vm0, %v1499_v63, 0.0  ;;  %v1516_v15 = vsel %vm595_vm0, %v1500_v7, 0.0  ;;  %v1518_v19 = vsel %vm595_vm0, %v1501_v22, 0.0  ;;  %v1520_v11 = vsel %vm617_vm1, %v1502_v62, 0.0 }
  0xcf   : > { %v1517_v17 = vadd.f32 %v1516_v15, %v1515_v30  ;;  %v1528_v43 = vsel %vm595_vm0, %v1503_v12, 0.0  ;;  %v1529_v2 = vsel %vm595_vm0, %v1504_v44, 0.0  ;;  %v1531_v18 = vsel %vm595_vm0, %v1505_v56, 0.0 }
  0xd0   : > { %v1530_v53 = vadd.f32 %v1529_v2, %v1528_v43  ;;  %v1533_v14 = vsel %vm617_vm1, %v1506_v25, 0.0  ;;  %v1541_v35 = vsel %vm595_vm0, %v1507_v13, 0.0  ;;  %v1542_v16 = vsel %vm595_vm0, %v1508_v49, 0.0 }
  0xd1   : > { %v1519_v10 = vadd.f32 %v1518_v19, %v1517_v17  ;;  %v1543_v20 = vadd.f32 %v1542_v16, %v1541_v35  ;;  %v1544_v48 = vsel %vm595_vm0, %v1509_v21, 0.0  ;;  %v1546_v61 = vsel %vm617_vm1, %v1510_v50, 0.0 }
  0xd2   : > { %v1532_v36 = vadd.f32 %v1531_v18, %v1530_v53  ;;  %v1554_v6 = vsel %vm595_vm0, %v1511_v39, 0.0  ;;  %v1555_v31 = vsel %vm595_vm0, %v1512_v0, 0.0  ;;  %v1557_v40 = vsel %vm595_vm0, %v1513_v57, 0.0 }
  0xd3   : > { %v1297_v5 = vrot.slane %v1296_v26, 2  ;;  %v1521_v8 = vadd.f32 %v1520_v11, %v1519_v10  ;;  %v1545_v41 = vadd.f32 %v1544_v48, %v1543_v20  ;;  %v1556_v37 = vadd.f32 %v1555_v31, %v1554_v6 }
  0xd4   : > { %v1260_v4 = vrot.slane %v3210_v38, 1  ;;  %v1285_v42 = vadd.f32 %v1284_v24, %v1283_v46  ;;  %v1534_v1 = vadd.f32 %v1533_v14, %v1532_v36  ;;  %v1559_v47 = vsel %vm617_vm1, %v1514_v51, 0.0 }
  0xd5   : > { %v1273_v45 = vrot.slane %v3212_v33, 1  ;;  %v1522_v59 = vrot.slane %v1521_v8, 4  ;;  %v1547_v52 = vadd.f32 %v1546_v61, %v1545_v41  ;;  %v1558_v28 = vadd.f32 %v1557_v40, %v1556_v37  ;;  %v1666_v41 = vld [vmem:[%s3329_s5] sm:$0xff] }
  0xd6   : > { %v1007_v55 = vadd.f32 %v1006_v29, %v3192_v3  ;;  %v1019_v60 = vrot.slane %v3196_v9, 1  ;;  %v1535_v63 = vrot.slane %v1534_v1, 4  ;;  %v1298_v32 = vadd.f32 %v1297_v5, %v1296_v26  ;;  %v2440_v5 = vld [vmem:[%s3328_s4] sm:$0xff]  }
  0xd7   : > { %v1523_v7 = vadd.f32 %v1522_v59, %v1521_v8  ;;  %v1548_v22 = vrot.slane %v1547_v52, 4  ;;  %v1560_v62 = vadd.f32 %v1559_v47, %v1558_v28  ;;  %v1032_v46 = vrot.slane %v3201_v54, 1  ;;  %2397 = vmatprep.mubr.msk.bf16.mxu1 %vm1616_vm10, %v2440_v5  ;;  %v1668_v8 = vld [vmem:[%s3329_s5 + $0x10] sm:$0xff]  ;;  %v1772_v47 = vld [vmem:[%s3331_s7 + $0x8] sm:$0xff] }
  0xd8   : > { %v1261_v24 = vadd.f32 %v1260_v4, %v3210_v38  ;;  %v1286_v12 = vrot.slane %v1285_v42, 1  ;;  %v1536_v44 = vadd.f32 %v1535_v63, %v1534_v1  ;;  %v1274_v56 = vadd.f32 %v1273_v45, %v3212_v33  ;;  %v1669_v4 = vld [vmem:[%s3329_s5 + $0x18] sm:$0xff]  ;;  %v1771_v1 = vld [vmem:[%s3331_s7] sm:$0xff] }
  0xd9   : > { %v1524_v25 = vrot.slane %v1523_v7, 2  ;;  %v1549_v13 = vadd.f32 %v1548_v22, %v1547_v52  ;;  %v1561_v49 = vrot.slane %v1560_v62, 4  ;;  %v1020_v3 = vadd.f32 %v1019_v60, %v3196_v9  ;;  %v2441_v60 = vld [vmem:[%s3328_s4 + $0x8] sm:$0xff]  }
  0xda   : > { %v1537_v29 = vrot.slane %v1536_v44, 2  ;;  %v1583_v26 = vsel %vm1582_vm6, %v1007_v55, %v3198_v23  ;;  %v1299_v21 = vrot.slane %v1298_v32, 1  ;;  %v1033_v38 = vadd.f32 %v1032_v46, %v3201_v54 }
  0xdb   : > { %v1525_v50 = vadd.f32 %v1524_v25, %v1523_v7  ;;  %v1550_v39 = vrot.slane %v1549_v13, 2  ;;  %v1562_v0 = vadd.f32 %v1561_v49, %v1560_v62  ;;  %v1287_v57 = vadd.f32 %v1286_v12, %v1285_v42  ;;  %v1667_v42 = vld [vmem:[%s3329_s5 + $0x8] sm:$0xff] }
  0xdc   : > { %v1538_v51 = vadd.f32 %v1537_v29, %v1536_v44  ;;  %v1574_v33 = vsel %vm1573_vm4, %v3185_v58, %v3204_v27  ;;  %v1593_v19 = vsel %vm1571_vm3, %v1274_v56, %v1261_v24  ;;  %v1585_v23 = vsel %vm1584_vm7, %v1020_v3, %v1583_v26 }
  0xdd   : > { %v1526_v30 = vrot.slane %v1525_v50, 1  ;;  %v1551_v15 = vadd.f32 %v1550_v39, %v1549_v13  ;;  %v1563_v9 = vrot.slane %v1562_v0, 2  ;;  %v1300_v17 = vadd.f32 %v1299_v21, %v1298_v32 }
  0xde   : > { %v1539_v11 = vrot.slane %v1538_v51, 1  ;;  %v1576_v53 = vsel %vm1575_vm5, %v3187_v34, %v1574_v33  ;;  %v1594_v14 = vsel %vm1573_vm4, %v1287_v57, %v1593_v19  ;;  %v1587_v35 = vsel %vm1586_vm8, %v1033_v38, %v1585_v23  ;;  %v2439_v34 = vld [vmem:[%s3327_s3] sm:$0xff]  }
  0xdf   : > { %v1527_v43 = vadd.f32 %v1526_v30, %v1525_v50  ;;  %v1552_v2 = vrot.slane %v1551_v15, 1  ;;  %v1564_v18 = vadd.f32 %v1563_v9, %v1562_v0  ;;  %v1595_v20 = vsel %vm1575_vm5, %v1300_v17, %v1594_v14 }
  0xe0   : > { %v1540_v54 = vadd.f32 %v1539_v11, %v1538_v51  ;;  %v1606_v61 = vsel %vm1605_vm9, %v1576_v53, %v1587_v35  ;;  %v3350_v40 = vmov 0.0   ;;  %v2510_v37 = vmov 0   ;;  %v2442_v51 = vld [vmem:[%s3330_s6] sm:$0xff]  }
  0xe1   : > { %v1553_v58 = vadd.f32 %v1552_v2, %v1551_v15  ;;  %v1565_v27 = vrot.slane %v1564_v18, 1  ;;  %2437 = vset.pattern.permute.xlu0 %v2510_v37  ;;  %2438 = vset.pattern.permute.xlu1 %v2510_v37  ;;  %vm1843_vm1 = vcmask 519168  }
  0xe2   : > { %v1601_v16 = vsel %vm1582_vm6, %v1540_v54, %v1527_v43  ;;  %1682 = vperm.xlu0 %2437, %v1668_v8   ;;  %1672 = vperm.xlu1 %2438, %v1666_v41  }
  0xe3   : > { %v1566_v10 = vadd.f32 %v1565_v27, %v1564_v18  ;;  %v1602_v48 = vsel %vm1584_vm7, %v1553_v58, %v1601_v16 }
  0xe5   : > { %v1603_v36 = vsel %vm1586_vm8, %v1566_v10, %v1602_v48 }
  0xe6   : > { %v1607_v6 = vsel %vm1605_vm9, %v1595_v20, %v1603_v36  ;;  %1687 = vperm.xlu0 %2437, %v1669_v4   ;;  %1677 = vperm.xlu1 %2438, %v1667_v42  }
  0xe7   : > { %v1610_v31 = vpack.c.bf16 %v1607_v6, %v1606_v61 }
  0xe9   : > { %2390 = vmatpush3.bf16.msra.mxu0 %v1610_v31 }
  0xea   : > { %2401 = vmatprep.subr.bf16.mxu0 %v3350_v40  ;;  %1775 = vperm.xlu0 %2437, %v1771_v1  }
  0xeb   : > { %1780 = vperm.xlu1 %2438, %v1772_v47  }
  0xec   : > { %2392 = vmatmul.mubr.msk.bf16.vlgmr.msra.gmra.mxu0 %vm1616_vm10, %v2439_v34 }
  0xed   : > { %2405 = vmatprep.mubr.msk.bf16.mxu0 %vm2509_vm2, %v3350_v40  ;;  %vm1852_vm2 = vcmask 7168  }
 0x15d   : > { %v1683_v63 = vpop.permute.xlu0 %1682  ;;  %v1673_v32 = vpop.permute.xlu1 %1672 }
 0x161   : > { %v1688_v46 = vpop.permute.xlu0 %1687  ;;  %v1678_v25 = vpop.permute.xlu1 %1677 }
 0x165   : > { %v1776_v33 = vpop.permute.xlu0 %1775 }
 0x166   : > { %v1781_v11 = vpop.permute.xlu1 %1780 }
 0x1ac   : > { %v1654_v45 = vpop.f32.mrf.mxu0 }
 0x1ae   : > { %v2393_v59 = vpop.f32.mrf.mxu0 }
 0x1b0   : > { %v1657_v52 = vpop.f32.mrf.mxu0 }
 0x1b1   : > { %v1665_v28 = vpack.c.bf16 %v1657_v52, %v1654_v45 }
 0x1b2   : > { %v2394_v55 = vpop.f32.mrf.mxu0 }
 0x1b3   : > { %2395 = vmatprep.subr.bf16.mxu1 %v1665_v28 }
 0x1b4   : > { %2396 = vmatpush3.bf16.msra.mxu1 %v1665_v28 }
 0x1b7   : > { %2398 = vmatmul.mubr.msk.bf16.vlgmr.msra.gmra.mxu1 %vm1616_vm10, %v2441_v60 }
 0x277   : > { %v2399_v7 = vpop.f32.mrf.mxu1 }
 0x278   : > { %v1749_v22 = vadd.f32 %v2399_v7, %v1683_v63 }
 0x279   : > { %v1740_v62 = vpop.f32.mrf.mxu1 }
 0x27a   : > { %v1761_v24 = vmul.f32 0.2, %v1749_v22  ;;  %vm1757_vm11 = vcmp.ge.f32.partialorder %v1749_v22, 0.0  ;;  %v1741_v44 = vadd.f32 %v1740_v62, %v1673_v32 }
 0x27b   : > { %v2400_v12 = vpop.f32.mrf.mxu1 }
 0x27c   : > { %v1752_v56 = vadd.f32 %v2400_v12, %v1688_v46  ;;  %v1765_v29 = vsel %vm1757_vm11, %v1749_v22, %v1761_v24  ;;  %v1759_v26 = vmul.f32 0.2, %v1741_v44  ;;  %vm1755_vm14 = vcmp.ge.f32.partialorder %v1741_v44, 0.0 }
 0x27d   : > { %v1743_v13 = vpop.f32.mrf.mxu1 }
 0x27e   : > { %vm1758_vm12 = vcmp.ge.f32.partialorder %v1752_v56, 0.0  ;;  %v1762_v49 = vmul.f32 0.2, %v1752_v56  ;;  %v1744_v3 = vadd.f32 %v1743_v13, %v1678_v25  ;;  %v1763_v38 = vsel %vm1755_vm14, %v1741_v44, %v1759_v26 }
 0x280   : > { %v1766_v21 = vsel %vm1758_vm12, %v1752_v56, %v1762_v49  ;;  %vm1756_vm13 = vcmp.ge.f32.partialorder %v1744_v3, 0.0  ;;  %v1760_v50 = vmul.f32 0.2, %v1744_v3 }
 0x281   : > { %v1770_v39 = vpack.c.bf16 %v1766_v21, %v1765_v29 }
 0x282   : > { %v1764_v0 = vsel %vm1756_vm13, %v1744_v3, %v1760_v50 }
 0x283   : > { %2402 = vmatpush3.bf16.msra.mxu0 %v1770_v39  ;;  %v1769_v57 = vpack.c.bf16 %v1764_v0, %v1763_v38 }
 0x284   : > { %2403 = vmatprep.subr.bf16.mxu0 %v3350_v40 }
 0x287   : > { %2404 = vmatpush3.bf16.msra.mxu0 %v1769_v57 }
 0x28a   : > { %2406 = vmatmul.mubr.msk.bf16.vlgmr.msra.gmra.mxu0 %vm1788_vm15, %v2442_v51 }
 0x34a   : > { %v1826_v30 = vpop.f32.mrf.mxu0 }
 0x34b   : > { %v1827_v15 = vadd.f32 %v1826_v30, %v1776_v33 }
 0x34c   : > { %v2407_v9 = vpop.f32.mrf.mxu0 }
 0x34d   : > { %v1833_v19 = vadd.f32 %v1827_v15, %v1654_v45 }
 0x34e   : > { %v1829_v23 = vpop.f32.mrf.mxu0 }
 0x34f   : > { %v2221_v17 = vpack.c.bf16 %v1833_v19, %v1833_v19  ;;  %v1830_v43 = vadd.f32 %v1829_v23, %v1781_v11  ;;  %v1846_v2 = vsel %vm595_vm0, %v1833_v19, 0.0  ;;  %v1855_v18 = vmul.f32 %v1833_v19, %v1833_v19 }
 0x350   : > { %1847 = vadd.xlane.f32.xlu0 %v1846_v2  ;;  %v2408_v54 = vpop.f32.mrf.mxu0 }
 0x351   : > { %1844 = vst.msk [vmem:[%s479_s21] sm:$0xf] %vm1843_vm1, %v2221_v17  ;;  %v1834_v53 = vadd.f32 %v1830_v43, %v1657_v52  ;;  %v1857_v58 = vsel %vm595_vm0, %v1855_v18, 0.0 }
 0x353   : > { %v2222_v14 = vpack.c.bf16 %v1834_v53, %v1834_v53  ;;  %v1849_v27 = vsel %vm595_vm0, %v1834_v53, 0.0  ;;  %v1856_v35 = vmul.f32 %v1834_v53, %v1834_v53 }
 0x354   : > { %1858 = vadd.xlane.f32.xlu0 %v1857_v58  ;;  %1850 = vadd.xlane.f32.xlu1 %v1849_v27 }
 0x355   : > { %1845 = vst.msk [vmem:[%s479_s21 + $0x4] sm:$0xf] %vm1843_vm1, %v2222_v14  ;;  %v1860_v16 = vsel %vm595_vm0, %v1856_v35, 0.0 }
 0x358   : > { %1861 = vadd.xlane.f32.xlu0 %v1860_v16 }
 0x3d9   : > { %v1848_v10 = vpop.xlane.xlu0 %1847 }
 0x3da   : > { %1853 = vst.msk [vmem:[%s488_s23] sm:$0xff] %vm1852_vm2, %v1848_v10 }
 0x3dd   : > { %v1859_v20 = vpop.xlane.xlu0 %1858  ;;  %v1851_v48 = vpop.xlane.xlu1 %1850 }
 0x3de   : > { %1863 = vst.msk [vmem:[%s497_s26] sm:$0xff] %vm1852_vm2, %v1859_v20  ;;  %1854 = vst.msk [vmem:[%s488_s23 + $0x8] sm:$0xff] %vm1852_vm2, %v1851_v48 }
 0x3e1   : > { %v1862_v61 = vpop.xlane.xlu0 %1861 }
 0x3e2   : > { %1864 = vst.msk [vmem:[%s497_s26 + $0x8] sm:$0xff] %vm1852_vm2, %v1862_v61 }
 0x3e3 PF: > { %s21_s15 = sadd.s32 1, %s2505_s15   ;;  %s3351_s13 = smov %s2501_s14 }
 0x3e4   : > { %p18_p5 = scmp.ge.s32.totalorder %s21_s15, 4   ;;  %s3352_s14 = smov %s3354_s16 }
 0x3e6   :  { %20 = sbr.rel (!%p18_p5) target bundleno = 2 (0x2), region = 118 }

// kernel: transformer_unit_forward.5
= control target key start
LH: loop header
LB: loop body
LE: loop exit
PB: predicated region body
PF: predicated region fallthrough
CT: control target
= control target key end

     0   :  { %s598_s18 = smov 0   ;;  %s600_s19 = smov 0   ;;  %s658_s0 = inlined_call_operand.vmem [shape: bf16[2,16,64], index: 0, kind: input, shape index: {}]   ;;  %s659_s1 = inlined_call_operand.vmem [shape: f32[2,1,16,1], index: 1, kind: input, shape index: {}]   ;;  %s660_s2 = inlined_call_operand.vmem [shape: f32[2,1,16,1], index: 2, kind: input, shape index: {}]   ;;  %s661_s3 = inlined_call_operand.vmem [shape: f32[16,1], index: 3, kind: input, shape index: {}]   ;;  %s662_s4 = inlined_call_operand.vmem [shape: f32[16,1], index: 4, kind: input, shape index: {}]   ;;  %s663_s5 = inlined_call_operand.vmem [shape: f32[2,16,64], index: 5, kind: output, shape index: {}]  }
   0x1   :  { %s602_s20 = smov 0  }
   0x2 LB: > { %s27_s21 = sadd.s32 1, %s561_s19  ;;  %p489_p0 = scmp.ge.s32.totalorder %s565_s20, 1  ;;  %s565_s20 = sphi %s602_s20, %s15_s20   ;;  %s561_s19 = sphi %s600_s19, %s665_s19   ;;  %s557_s18 = sphi %s598_s18, %s664_s18  }
   0x3   : > { %p29_p1 = scmp.ge.s32.totalorder %s27_s21, 2  ;;  %p226_p2 = scmp.lt.s32.totalorder %s565_s20, 3 }
   0x5   : > { %s667_s21 = smov (%p29_p1, %s27_s21), 0  ;;  %p227_p3 = pnand %p489_p0, %p226_p2 }
   0x6   : > { %p270_p4 = scmp.lt.s32.totalorder (!%p227_p3), %s557_s18, 1 }
   0x7   : > { %230 = sbr.rel (%p227_p3) target bundleno = 302 (0x12e), region = 40 }
   0xc   : > { %s669_s18 = smov (!%p270_p4, %s557_s18), 1  ;;  %vm302_vm0 = vcmask 7168   ;;  %v567_v10 = vmov 0   ;;  %v347_v11 = vld [vmem:[%s661_s3] sm:$0xff]  ;;  %v348_v12 = vld [vmem:[%s661_s3 + $0x8] sm:$0xff]  ;;  %vm375_vm1 = vcmask 523264  }
   0xd   : > { %s619_s22 = sshll.u32 %s669_s18, 4  ;;  %539 = vset.pattern.permute.xlu1 %v567_v10  ;;  %540 = vset.pattern.permute.xlu0 %v567_v10  ;;  %v362_v13 = vld [vmem:[%s662_s4 + $0x8] sm:$0xff]  ;;  %v361_v14 = vld [vmem:[%s662_s4] sm:$0xff]  ;;  %s500_s24 = sshll.u32 %s669_s18, 3 }
   0xe   : > { %s282_s25 = scalar_lea.vmem %s659_s1, %s619_s22  ;;  %s287_s28 = scalar_lea.vmem %s660_s2, %s619_s22  ;;  %351 = vperm.xlu1 %539, %v347_v11  }
   0xf   : > { %v300_v0 = vld [vmem:[%s282_s25] sm:$0xff]  ;;  %v301_v1 = vld [vmem:[%s282_s25 + $0x8] sm:$0xff]  ;;  %s277_s27 = scalar_lea.vmem %s658_s0, %s500_s24  ;;  %s295_s30 = scalar_lea.vmem %s663_s5, %s619_s22 }
  0x10   : > { %v318_v2 = vld [vmem:[%s287_s28] sm:$0xff]  ;;  %v303_v3 = vsel %vm302_vm0, %v300_v0, 0.0  ;;  %v304_v4 = vsel %vm302_vm0, %v301_v1, 0.0  ;;  %v319_v5 = vld [vmem:[%s287_s28 + $0x8] sm:$0xff] }
  0x11   : > { %v320_v6 = vsel %vm302_vm0, %v318_v2, 0.0  ;;  %v305_v7 = vadd.f32 %v304_v4, %v303_v3  ;;  %v321_v8 = vsel %vm302_vm0, %v319_v5, 0.0  ;;  %v505_v32 = vld [vmem:[%s277_s27] sm:$0xff]  }
  0x12   : > { %v322_v9 = vadd.f32 %v321_v8, %v320_v6  ;;  %356 = vperm.xlu1 %539, %v348_v12   ;;  %v506_v33 = vunpack.c.l.bf16 %v505_v32  ;;  %v507_v34 = vunpack.c.h.bf16 %v505_v32 }
  0x13   : > { %306 = vadd.xlane.f32.xlu0 %v305_v7 }
  0x16   : > { %370 = vperm.xlu1 %539, %v362_v13  }
  0x17   : > { %323 = vadd.xlane.f32.xlu0 %v322_v9 }
  0x2d   : > { %365 = vperm.xlu0 %540, %v361_v14  }
  0x89   : > { %v352_v31 = vpop.permute.xlu1 %351 }
  0x8d   : > { %v357_v36 = vpop.permute.xlu1 %356 }
  0x91   : > { %v371_v45 = vpop.permute.xlu1 %370 }
  0x9c   : > { %v307_v15 = vpop.xlane.xlu0 %306 }
  0x9d   : > { %v308_v16 = vrot.slane %v307_v15, 4 }
  0x9f   : > { %v309_v17 = vadd.f32 %v308_v16, %v307_v15 }
  0xa0   : > { %v324_v18 = vpop.xlane.xlu0 %323 }
  0xa1   : > { %v310_v19 = vrot.slane %v309_v17, 2  ;;  %v325_v20 = vrot.slane %v324_v18, 4 }
  0xa3   : > { %v326_v21 = vadd.f32 %v325_v20, %v324_v18  ;;  %v311_v22 = vadd.f32 %v310_v19, %v309_v17 }
  0xa5   : > { %v327_v23 = vrot.slane %v326_v21, 2  ;;  %v312_v24 = vrot.slane %v311_v22, 1 }
  0xa7   : > { %v313_v25 = vadd.f32 %v312_v24, %v311_v22  ;;  %v328_v26 = vadd.f32 %v327_v23, %v326_v21 }
  0xa8   : > { %v366_v42 = vpop.permute.xlu0 %365 }
  0xa9   : > { %508 = vpush %v313_v25  ;;  %v329_v27 = vrot.slane %v328_v26, 1 }
  0xab   : > { %v330_v28 = vadd.f32 %v329_v27, %v328_v26 }
  0xad   : > { %510 = vpush %v330_v28 }
  0xda   : > { %s509_s12 = spop %508 }
  0xdb   : > { %s317_s13 = smul.f32 0.0009765625, %s509_s12 }
  0xdd   : > { %s335_s14 = smul.f32 %s317_s13, %s317_s13  ;;  %v341_v35 = vstv %s317_s13 }
  0xde   : > { %s511_s15 = spop %510  ;;  %v342_v37 = vsub.f32 %v506_v33, %v341_v35  ;;  %v343_v38 = vsub.f32 %v507_v34, %v341_v35 }
  0xdf   : > { %s334_s16 = smul.f32 0.0009765625, %s511_s15 }
  0xe1   : > { %s336_s17 = ssub.f32 %s334_s16, %s335_s14 }
  0xe3   : > { %s337_s23 = sadd.f32 1e-05, %s336_s17 }
  0xe5   : > { %v338_v29 = vstv %s337_s23 }
  0xe6   : > { %541 = vrsqrt.f32 %v338_v29 }
  0xf3   : > { %v542_v30 = vpop.eup %541 }
  0xf4   : > { %512 = vpush %v542_v30 }
 0x125   : > { %s513_s28 = spop %512 }
 0x126   : > { %v344_v39 = vstv %s513_s28 }
 0x127   : > { %v345_v40 = vmul.f32 %v344_v39, %v342_v37  ;;  %v346_v41 = vmul.f32 %v344_v39, %v343_v38 }
 0x129   : > { %v360_v43 = vmul.f32 %v357_v36, %v346_v41  ;;  %v359_v44 = vmul.f32 %v352_v31, %v345_v40 }
 0x12b   : > { %v374_v46 = vadd.f32 %v371_v45, %v360_v43  ;;  %v373_v47 = vadd.f32 %v366_v42, %v359_v44 }
 0x12d   : > { %376 = vst.msk [vmem:[%s295_s30] sm:$0xff] %vm375_vm1, %v373_v47  ;;  %377 = vst.msk [vmem:[%s295_s30 + $0x8] sm:$0xff] %vm375_vm1, %v374_v46 }
 0x12e PF: > { %s15_s20 = sadd.s32 1, %s565_s20   ;;  %s664_s18 = smov %s561_s19 }
 0x12f   : > { %p12_p5 = scmp.ge.s32.totalorder %s15_s20, 4   ;;  %s665_s19 = smov %s667_s21 }
 0x131   :  { %14 = sbr.rel (!%p12_p5) target bundleno = 2 (0x2), region = 76 }

</bundles_post_ra>
